<compile_context>
chip_gen: v7x
topology: tpu7x:2x2x1
jax: 0.10.0
libtpu: 0.0.40
codegen_flags: <defaults>
</compile_context>

<pallas_src>
import functools

import jax
import jax.numpy as jnp
from jax import lax
from jax.experimental import pallas as pl
from jax.experimental.pallas import tpu as pltpu

# ---------------- configuration (small, consistent with the module) ----------
N_BATCH = 2
C_IN = 4
SEQ_LEN = 128
N_FILTERS = 8
BOTTLENECK = 32
KERNEL_SIZES = (9, 19, 39)
PAD_MAX = max(KERNEL_SIZES) // 2              # 19
K_TAPS = max(KERNEL_SIZES)                    # 39 shift positions (d in [-19, 19])
C_OUT = 4 * N_FILTERS                         # 32
VALID_OFF = 128                               # 128-aligned start of data per segment
BN_EPS = 1e-5
SELU_ALPHA = 1.6732632423543772
SELU_SCALE = 1.0507009873554805
NEG_BIG = 1e30                                # finite "-inf" sentinel for maxpool pad


def _rup(x, m):
    return ((x + m - 1) // m) * m


C8 = _rup(C_IN, 8)                            # 8: per-shift stack block rows
K_USED = (K_TAPS + 1) * C8                    # 320 = 39 shift blocks + maxpool block
K_PAD = _rup(K_USED, 128)                     # 384, K aligned to 128


# ------------------------------- Pallas kernel -------------------------------
def inception_kernel(x_ref, w_ref, neg_ref, clean_ref, gamma_ref, beta_ref,
                     out_ref, stack_ref, *, n_batch, seq_len, seg):
    """x_ref:     (C8, XW)      zero-padded, batch-folded input (+shift halo)
    w_ref:     (C_OUT, K_PAD)   fused (bottleneck-folded) lane-dense weights
    neg_ref:   (C8, XW)         0 at data columns, -1e30 at pad columns
    clean_ref: (C8, W)          1 at data columns, 0 at pad columns
    gamma/beta:(C_OUT, 1)       BatchNorm affine params
    out_ref:   (C_OUT, N*L)     lane-dense output slab
    stack_ref: (K_PAD, W)       VMEM scratch for the im2col stack
    """
    L = seq_len
    W = n_batch * seg
    G = PAD_MAX

    xw = x_ref[...]                                               # (C8, XW)

    # ---- im2col of the raw padded input: 39 lane-shifted copies -------------
    # bottleneck is folded into w_ref, so each block is a full 8-sublane,
    # W-lane (multiple of 128) tile-aligned store — no masked stores.
    for i in range(K_TAPS):                                        # static unroll
        stack_ref[i * C8:(i + 1) * C8, :] = xw[:, i:i + W]

    # ---- maxpool(k=3, s=1, p=1) with PyTorch -inf-style per-batch padding ----
    x_m = xw + neg_ref[...]                        # pad columns -> -1e30 (finite)
    xmax = jnp.maximum(jnp.maximum(x_m[:, G:G + W], x_m[:, G - 1:G - 1 + W]),
                       x_m[:, G + 1:G + 1 + W])
    stack_ref[K_TAPS * C8:K_USED, :] = xmax * clean_ref[...]   # keep stack finite

    # zero the K-padding rows: stale VMEM x zero weight could inject NaN
    stack_ref[K_USED:K_PAD, :] = jnp.zeros((K_PAD - K_USED, W), jnp.float32)

    # ---- all four branches in ONE MXU matmul: (32, 384) @ (384, W) ----------
    z_full = jnp.dot(w_ref[...], stack_ref[...],
                     preferred_element_type=jnp.float32)          # (C_OUT, W)

    # ---- extract per-batch valid windows straight into the output slab ------
    # source offset n*seg+128 and dest offset n*L are lane(128)-aligned.
    for n in range(n_batch):
        s = n * seg + VALID_OFF
        out_ref[:, n * L:(n + 1) * L] = z_full[:, s:s + L]

    # ---- BatchNorm1d, training mode: biased batch stats, single pass --------
    z = out_ref[...]                                              # (C_OUT, N*L)
    denom = 1.0 / float(n_batch * L)
    mean = jnp.sum(z, axis=1, keepdims=True) * denom
    var = jnp.sum(z * z, axis=1, keepdims=True) * denom - mean * mean
    scale = lax.rsqrt(var + BN_EPS) * gamma_ref[...]
    shift = beta_ref[...] - mean * scale

    # ---- affine + SELU, lane-dense store -------------------------------------
    y = z * scale + shift
    y = SELU_SCALE * jnp.where(
        y > 0, y, SELU_ALPHA * (jnp.exp(jnp.minimum(y, 0.0)) - 1.0))
    out_ref[...] = y


# ------------------------------- host-side packing ----------------------------
def pack_weights(wb_t, w1_t, w2_t, w3_t, w4_t):
    """PyTorch-layout conv weights -> fused lane-dense (C_OUT, K_PAD) matrix.

    Stack row / weight column layout:
      cols [i*C8, i*C8+C_IN): shift d = i - PAD_MAX of the *input* channels,
        with the bottleneck 1x1 conv folded in:
        w[o, i*C8 + c] = sum_b w_branch[o, b, tap(i)] * wb[b, c]   (exact)
      cols [K_TAPS*C8, K_TAPS*C8+C_IN): 1x1 conv-from-maxpool weights
      all other columns zero (channel pad to 8, K pad to 384).
    """
    wb = wb_t[:, :, 0]                                           # (BOTTLENECK, C_IN)
    blocks = []
    for w_t in (w1_t, w2_t, w3_t):                               # (nf, BOTTLENECK, k)
        k = w_t.shape[-1]
        p = k // 2
        wp = jnp.pad(w_t, ((0, 0), (0, 0), (PAD_MAX - p, PAD_MAX - p)))  # taps -> 39
        wf = jnp.einsum('obt,bc->otc', wp, wb)                   # (nf, 39, C_IN)
        wf = jnp.pad(wf, ((0, 0), (0, 0), (0, C8 - C_IN)))       # (nf, 39, 8)
        blocks.append(wf.reshape(N_FILTERS, K_TAPS * C8))
    top = jnp.concatenate(blocks, axis=0)                        # (24, 312)
    top = jnp.pad(top, ((0, 0), (0, C8)))                        # (24, 320)
    w4 = jnp.pad(w4_t[:, :, 0], ((0, 0), (0, C8 - C_IN)))        # (nf, 8)
    bot = jnp.concatenate(
        [jnp.zeros((N_FILTERS, K_TAPS * C8), jnp.float32), w4], axis=1)   # (8, 320)
    w_full = jnp.concatenate([top, bot], axis=0)                 # (32, 320)
    return jnp.pad(w_full, ((0, 0), (0, K_PAD - K_USED)))        # (32, 384)


# ------------------------------- wrapper --------------------------------------
def inception_forward(x, w_full, gamma, beta):
    """x: (N, C_in, L) float32 (PyTorch NCL). Returns (N, 4*n_filters, L)."""
    n, c_in, L = x.shape
    assert c_in == C_IN
    Lr = _rup(L, 128)
    seg = VALID_OFF + Lr                       # per-batch segment, multiple of 128
    W = n * seg                                # folded (lane-dense) matmul width
    XW = _rup(PAD_MAX + W + PAD_MAX, 128)      # input slab width incl. shift halo

    # fold batch onto lanes: batch b's data lives at fold columns
    # [b*seg+128, b*seg+128+L); everything else is zero (this zero padding IS
    # the convs' "same" padding); channels padded to 8 sublanes.
    xp = jnp.pad(x, ((0, 0), (0, C8 - c_in), (VALID_OFF, Lr - L)))   # (N, 8, seg)
    x_fold = jnp.transpose(xp, (1, 0, 2)).reshape(C8, W)             # (8, W)
    x_wide = jnp.pad(x_fold, ((0, 0), (PAD_MAX, XW - PAD_MAX - W)))  # (8, XW)

    # precomputed maxpool boundary masks (no mask construction in-kernel)
    vcol = jnp.zeros((seg,), jnp.float32).at[VALID_OFF:VALID_OFF + L].set(1.0)
    vfold = jnp.tile(vcol, (n,))                                      # (W,)
    clean = jnp.broadcast_to(vfold, (C8, W))                          # 1=data, 0=pad
    vwide = jnp.pad(vfold, (PAD_MAX, XW - PAD_MAX - W))
    neg = jnp.broadcast_to((vwide - 1.0) * NEG_BIG, (C8, XW))         # 0 / -1e30

    kernel = functools.partial(inception_kernel, n_batch=n, seq_len=L, seg=seg)
    vmem = pl.BlockSpec(memory_space=pltpu.MemorySpace.VMEM)
    # TODO(synk): at production shapes, tile the folded width with a halo-aware
    # index_map and ("parallel", ...) dimension_semantics so both v7x TensorCores
    # are used, and set vmem_limit_bytes for the 64 MiB / 32 MiB-scoped budget;
    # at these toy shapes a single un-gridded call is fastest.
    out2d = pl.pallas_call(
        kernel,
        out_shape=jax.ShapeDtypeStruct((C_OUT, n * L), jnp.float32),
        in_specs=[vmem] * 6,
        out_specs=vmem,
        scratch_shapes=[pltpu.VMEM((K_PAD, W), jnp.float32)],
    )(x_wide, w_full, neg, clean, gamma.reshape(C_OUT, 1), beta.reshape(C_OUT, 1))

    return jnp.transpose(out2d.reshape(C_OUT, n, L), (1, 0, 2))


# --------------------------- pure-JAX reference --------------------------------
def reference_forward(x, torch_params):
    wb_t, w1_t, w2_t, w3_t, w4_t, gamma, beta = torch_params     # PyTorch layouts
    dn = ("NCH", "OIH", "NCH")

    def conv(z, w, pad):
        return lax.conv_general_dilated(z, w, (1,), [(pad, pad)],
                                        dimension_numbers=dn)

    zb = conv(x, wb_t, 0)
    zmax = lax.reduce_window(x, -jnp.inf, lax.max,
                             (1, 1, 3), (1, 1, 1), [(0, 0), (0, 0), (1, 1)])
    z1 = conv(zb, w1_t, KERNEL_SIZES[0] // 2)
    z2 = conv(zb, w2_t, KERNEL_SIZES[1] // 2)
    z3 = conv(zb, w3_t, KERNEL_SIZES[2] // 2)
    z4 = conv(zmax, w4_t, 0)
    z = jnp.concatenate([z1, z2, z3, z4], axis=1)

    mean = jnp.mean(z, axis=(0, 2), keepdims=True)
    var = jnp.var(z, axis=(0, 2), keepdims=True)                 # biased, like PyTorch
    z = (z - mean) / jnp.sqrt(var + BN_EPS)
    z = z * gamma.reshape(1, -1, 1) + beta.reshape(1, -1, 1)
    return jax.nn.selu(z)


# ------------------------------------ main -------------------------------------
if __name__ == "__main__":
    key = jax.random.PRNGKey(0)
    kx, kb, k1, k2, k3, k4, kg, kbt = jax.random.split(key, 8)

    x = jax.random.normal(kx, (N_BATCH, C_IN, SEQ_LEN), dtype=jnp.float32)

    # deterministic parameters in PyTorch Conv1d layout (out, in, k), no bias
    wb_t = 0.1 * jax.random.normal(kb, (BOTTLENECK, C_IN, 1), dtype=jnp.float32)
    w1_t = 0.1 * jax.random.normal(k1, (N_FILTERS, BOTTLENECK, KERNEL_SIZES[0]), dtype=jnp.float32)
    w2_t = 0.1 * jax.random.normal(k2, (N_FILTERS, BOTTLENECK, KERNEL_SIZES[1]), dtype=jnp.float32)
    w3_t = 0.1 * jax.random.normal(k3, (N_FILTERS, BOTTLENECK, KERNEL_SIZES[2]), dtype=jnp.float32)
    w4_t = 0.1 * jax.random.normal(k4, (N_FILTERS, C_IN, 1), dtype=jnp.float32)
    gamma = 1.0 + 0.1 * jax.random.normal(kg, (C_OUT,), dtype=jnp.float32)
    beta = 0.1 * jax.random.normal(kbt, (C_OUT,), dtype=jnp.float32)

    # fused, bottleneck-folded, lane-dense kernel weights (host-side packing)
    w_full = pack_weights(wb_t, w1_t, w2_t, w3_t, w4_t)

    out = inception_forward(x, w_full, gamma, beta)
    out = jax.block_until_ready(out)

    ref = reference_forward(x, (wb_t, w1_t, w2_t, w3_t, w4_t, gamma, beta))
    ref = jax.block_until_ready(ref)

    assert out.shape == (N_BATCH, C_OUT, SEQ_LEN)
    err = jnp.max(jnp.abs(out - ref))
    assert jnp.allclose(out, ref, atol=2e-4, rtol=2e-4), f"max abs err = {err}"

    print("KERNEL_OK")
</pallas_src>

<mosaic_0001>
module attributes {stable_mosaic.version = 11 : i64} {
  func.func @inception_kernel(%arg0: memref<8x640xf32, #tpu.memory_space<vmem>>, %arg1: memref<32x384xf32, #tpu.memory_space<vmem>>, %arg2: memref<8x640xf32, #tpu.memory_space<vmem>>, %arg3: memref<8x512xf32, #tpu.memory_space<vmem>>, %arg4: memref<32x1xf32, #tpu.memory_space<vmem>>, %arg5: memref<32x1xf32, #tpu.memory_space<vmem>>, %arg6: memref<32x256xf32, #tpu.memory_space<vmem>>, %arg7: memref<384x512xf32, #tpu.memory_space<vmem>>) attributes {dimension_semantics = [], scalar_prefetch = 0 : i64, scratch_operands = 1 : i64, tpu.core_type = #tpu.core_type<tc>} {
    %c0 = arith.constant 0 : index
    %c0_0 = arith.constant 0 : index
    %0 = vector.load %arg0[%c0, %c0_0] : memref<8x640xf32, #tpu.memory_space<vmem>>, vector<8x640xf32>
    %1 = vector.extract_strided_slice %0 {offsets = [0, 0], sizes = [8, 512], strides = [1, 1]} : vector<8x640xf32> to vector<8x512xf32>
    %c0_1 = arith.constant 0 : index
    %c0_2 = arith.constant 0 : index
    %2 = vector.load %arg7[%c0_1, %c0_2] : memref<384x512xf32, #tpu.memory_space<vmem>>, vector<8x512xf32>
    tpu.vector_store %arg7[%c0_1, %c0_2], %1 {strides = array<i32>} : memref<384x512xf32, #tpu.memory_space<vmem>>, vector<8x512xf32>,
    %3 = vector.extract_strided_slice %0 {offsets = [0, 1], sizes = [8, 512], strides = [1, 1]} : vector<8x640xf32> to vector<8x512xf32>
    %c8 = arith.constant 8 : index
    %c0_3 = arith.constant 0 : index
    %4 = vector.load %arg7[%c8, %c0_3] : memref<384x512xf32, #tpu.memory_space<vmem>>, vector<8x512xf32>
    tpu.vector_store %arg7[%c8, %c0_3], %3 {strides = array<i32>} : memref<384x512xf32, #tpu.memory_space<vmem>>, vector<8x512xf32>,
    %5 = vector.extract_strided_slice %0 {offsets = [0, 2], sizes = [8, 512], strides = [1, 1]} : vector<8x640xf32> to vector<8x512xf32>
    %c16 = arith.constant 16 : index
    %c0_4 = arith.constant 0 : index
    %6 = vector.load %arg7[%c16, %c0_4] : memref<384x512xf32, #tpu.memory_space<vmem>>, vector<8x512xf32>
    tpu.vector_store %arg7[%c16, %c0_4], %5 {strides = array<i32>} : memref<384x512xf32, #tpu.memory_space<vmem>>, vector<8x512xf32>,
    %7 = vector.extract_strided_slice %0 {offsets = [0, 3], sizes = [8, 512], strides = [1, 1]} : vector<8x640xf32> to vector<8x512xf32>
    %c24 = arith.constant 24 : index
    %c0_5 = arith.constant 0 : index
    %8 = vector.load %arg7[%c24, %c0_5] : memref<384x512xf32, #tpu.memory_space<vmem>>, vector<8x512xf32>
    tpu.vector_store %arg7[%c24, %c0_5], %7 {strides = array<i32>} : memref<384x512xf32, #tpu.memory_space<vmem>>, vector<8x512xf32>,
    %9 = vector.extract_strided_slice %0 {offsets = [0, 4], sizes = [8, 512], strides = [1, 1]} : vector<8x640xf32> to vector<8x512xf32>
    %c32 = arith.constant 32 : index
    %c0_6 = arith.constant 0 : index
    %10 = vector.load %arg7[%c32, %c0_6] : memref<384x512xf32, #tpu.memory_space<vmem>>, vector<8x512xf32>
    tpu.vector_store %arg7[%c32, %c0_6], %9 {strides = array<i32>} : memref<384x512xf32, #tpu.memory_space<vmem>>, vector<8x512xf32>,
    %11 = vector.extract_strided_slice %0 {offsets = [0, 5], sizes = [8, 512], strides = [1, 1]} : vector<8x640xf32> to vector<8x512xf32>
    %c40 = arith.constant 40 : index
    %c0_7 = arith.constant 0 : index
    %12 = vector.load %arg7[%c40, %c0_7] : memref<384x512xf32, #tpu.memory_space<vmem>>, vector<8x512xf32>
    tpu.vector_store %arg7[%c40, %c0_7], %11 {strides = array<i32>} : memref<384x512xf32, #tpu.memory_space<vmem>>, vector<8x512xf32>,
    %13 = vector.extract_strided_slice %0 {offsets = [0, 6], sizes = [8, 512], strides = [1, 1]} : vector<8x640xf32> to vector<8x512xf32>
    %c48 = arith.constant 48 : index
    %c0_8 = arith.constant 0 : index
    %14 = vector.load %arg7[%c48, %c0_8] : memref<384x512xf32, #tpu.memory_space<vmem>>, vector<8x512xf32>
    tpu.vector_store %arg7[%c48, %c0_8], %13 {strides = array<i32>} : memref<384x512xf32, #tpu.memory_space<vmem>>, vector<8x512xf32>,
    %15 = vector.extract_strided_slice %0 {offsets = [0, 7], sizes = [8, 512], strides = [1, 1]} : vector<8x640xf32> to vector<8x512xf32>
    %c56 = arith.constant 56 : index
    %c0_9 = arith.constant 0 : index
    %16 = vector.load %arg7[%c56, %c0_9] : memref<384x512xf32, #tpu.memory_space<vmem>>, vector<8x512xf32>
    tpu.vector_store %arg7[%c56, %c0_9], %15 {strides = array<i32>} : memref<384x512xf32, #tpu.memory_space<vmem>>, vector<8x512xf32>,
    %17 = vector.extract_strided_slice %0 {offsets = [0, 8], sizes = [8, 512], strides = [1, 1]} : vector<8x640xf32> to vector<8x512xf32>
    %c64 = arith.constant 64 : index
    %c0_10 = arith.constant 0 : index
    %18 = vector.load %arg7[%c64, %c0_10] : memref<384x512xf32, #tpu.memory_space<vmem>>, vector<8x512xf32>
    tpu.vector_store %arg7[%c64, %c0_10], %17 {strides = array<i32>} : memref<384x512xf32, #tpu.memory_space<vmem>>, vector<8x512xf32>,
    %19 = vector.extract_strided_slice %0 {offsets = [0, 9], sizes = [8, 512], strides = [1, 1]} : vector<8x640xf32> to vector<8x512xf32>
    %c72 = arith.constant 72 : index
    %c0_11 = arith.constant 0 : index
    %20 = vector.load %arg7[%c72, %c0_11] : memref<384x512xf32, #tpu.memory_space<vmem>>, vector<8x512xf32>
    tpu.vector_store %arg7[%c72, %c0_11], %19 {strides = array<i32>} : memref<384x512xf32, #tpu.memory_space<vmem>>, vector<8x512xf32>,
    %21 = vector.extract_strided_slice %0 {offsets = [0, 10], sizes = [8, 512], strides = [1, 1]} : vector<8x640xf32> to vector<8x512xf32>
    %c80 = arith.constant 80 : index
    %c0_12 = arith.constant 0 : index
    %22 = vector.load %arg7[%c80, %c0_12] : memref<384x512xf32, #tpu.memory_space<vmem>>, vector<8x512xf32>
    tpu.vector_store %arg7[%c80, %c0_12], %21 {strides = array<i32>} : memref<384x512xf32, #tpu.memory_space<vmem>>, vector<8x512xf32>,
    %23 = vector.extract_strided_slice %0 {offsets = [0, 11], sizes = [8, 512], strides = [1, 1]} : vector<8x640xf32> to vector<8x512xf32>
    %c88 = arith.constant 88 : index
    %c0_13 = arith.constant 0 : index
    %24 = vector.load %arg7[%c88, %c0_13] : memref<384x512xf32, #tpu.memory_space<vmem>>, vector<8x512xf32>
    tpu.vector_store %arg7[%c88, %c0_13], %23 {strides = array<i32>} : memref<384x512xf32, #tpu.memory_space<vmem>>, vector<8x512xf32>,
    %25 = vector.extract_strided_slice %0 {offsets = [0, 12], sizes = [8, 512], strides = [1, 1]} : vector<8x640xf32> to vector<8x512xf32>
    %c96 = arith.constant 96 : index
    %c0_14 = arith.constant 0 : index
    %26 = vector.load %arg7[%c96, %c0_14] : memref<384x512xf32, #tpu.memory_space<vmem>>, vector<8x512xf32>
    tpu.vector_store %arg7[%c96, %c0_14], %25 {strides = array<i32>} : memref<384x512xf32, #tpu.memory_space<vmem>>, vector<8x512xf32>,
    %27 = vector.extract_strided_slice %0 {offsets = [0, 13], sizes = [8, 512], strides = [1, 1]} : vector<8x640xf32> to vector<8x512xf32>
    %c104 = arith.constant 104 : index
    %c0_15 = arith.constant 0 : index
    %28 = vector.load %arg7[%c104, %c0_15] : memref<384x512xf32, #tpu.memory_space<vmem>>, vector<8x512xf32>
    tpu.vector_store %arg7[%c104, %c0_15], %27 {strides = array<i32>} : memref<384x512xf32, #tpu.memory_space<vmem>>, vector<8x512xf32>,
    %29 = vector.extract_strided_slice %0 {offsets = [0, 14], sizes = [8, 512], strides = [1, 1]} : vector<8x640xf32> to vector<8x512xf32>
    %c112 = arith.constant 112 : index
    %c0_16 = arith.constant 0 : index
    %30 = vector.load %arg7[%c112, %c0_16] : memref<384x512xf32, #tpu.memory_space<vmem>>, vector<8x512xf32>
    tpu.vector_store %arg7[%c112, %c0_16], %29 {strides = array<i32>} : memref<384x512xf32, #tpu.memory_space<vmem>>, vector<8x512xf32>,
    %31 = vector.extract_strided_slice %0 {offsets = [0, 15], sizes = [8, 512], strides = [1, 1]} : vector<8x640xf32> to vector<8x512xf32>
    %c120 = arith.constant 120 : index
    %c0_17 = arith.constant 0 : index
    %32 = vector.load %arg7[%c120, %c0_17] : memref<384x512xf32, #tpu.memory_space<vmem>>, vector<8x512xf32>
    tpu.vector_store %arg7[%c120, %c0_17], %31 {strides = array<i32>} : memref<384x512xf32, #tpu.memory_space<vmem>>, vector<8x512xf32>,
    %33 = vector.extract_strided_slice %0 {offsets = [0, 16], sizes = [8, 512], strides = [1, 1]} : vector<8x640xf32> to vector<8x512xf32>
    %c128 = arith.constant 128 : index
    %c0_18 = arith.constant 0 : index
    %34 = vector.load %arg7[%c128, %c0_18] : memref<384x512xf32, #tpu.memory_space<vmem>>, vector<8x512xf32>
    tpu.vector_store %arg7[%c128, %c0_18], %33 {strides = array<i32>} : memref<384x512xf32, #tpu.memory_space<vmem>>, vector<8x512xf32>,
    %35 = vector.extract_strided_slice %0 {offsets = [0, 17], sizes = [8, 512], strides = [1, 1]} : vector<8x640xf32> to vector<8x512xf32>
    %c136 = arith.constant 136 : index
    %c0_19 = arith.constant 0 : index
    %36 = vector.load %arg7[%c136, %c0_19] : memref<384x512xf32, #tpu.memory_space<vmem>>, vector<8x512xf32>
    tpu.vector_store %arg7[%c136, %c0_19], %35 {strides = array<i32>} : memref<384x512xf32, #tpu.memory_space<vmem>>, vector<8x512xf32>,
    %37 = vector.extract_strided_slice %0 {offsets = [0, 18], sizes = [8, 512], strides = [1, 1]} : vector<8x640xf32> to vector<8x512xf32>
    %c144 = arith.constant 144 : index
    %c0_20 = arith.constant 0 : index
    %38 = vector.load %arg7[%c144, %c0_20] : memref<384x512xf32, #tpu.memory_space<vmem>>, vector<8x512xf32>
    tpu.vector_store %arg7[%c144, %c0_20], %37 {strides = array<i32>} : memref<384x512xf32, #tpu.memory_space<vmem>>, vector<8x512xf32>,
    %39 = vector.extract_strided_slice %0 {offsets = [0, 19], sizes = [8, 512], strides = [1, 1]} : vector<8x640xf32> to vector<8x512xf32>
    %c152 = arith.constant 152 : index
    %c0_21 = arith.constant 0 : index
    %40 = vector.load %arg7[%c152, %c0_21] : memref<384x512xf32, #tpu.memory_space<vmem>>, vector<8x512xf32>
    tpu.vector_store %arg7[%c152, %c0_21], %39 {strides = array<i32>} : memref<384x512xf32, #tpu.memory_space<vmem>>, vector<8x512xf32>,
    %41 = vector.extract_strided_slice %0 {offsets = [0, 20], sizes = [8, 512], strides = [1, 1]} : vector<8x640xf32> to vector<8x512xf32>
    %c160 = arith.constant 160 : index
    %c0_22 = arith.constant 0 : index
    %42 = vector.load %arg7[%c160, %c0_22] : memref<384x512xf32, #tpu.memory_space<vmem>>, vector<8x512xf32>
    tpu.vector_store %arg7[%c160, %c0_22], %41 {strides = array<i32>} : memref<384x512xf32, #tpu.memory_space<vmem>>, vector<8x512xf32>,
    %43 = vector.extract_strided_slice %0 {offsets = [0, 21], sizes = [8, 512], strides = [1, 1]} : vector<8x640xf32> to vector<8x512xf32>
    %c168 = arith.constant 168 : index
    %c0_23 = arith.constant 0 : index
    %44 = vector.load %arg7[%c168, %c0_23] : memref<384x512xf32, #tpu.memory_space<vmem>>, vector<8x512xf32>
    tpu.vector_store %arg7[%c168, %c0_23], %43 {strides = array<i32>} : memref<384x512xf32, #tpu.memory_space<vmem>>, vector<8x512xf32>,
    %45 = vector.extract_strided_slice %0 {offsets = [0, 22], sizes = [8, 512], strides = [1, 1]} : vector<8x640xf32> to vector<8x512xf32>
    %c176 = arith.constant 176 : index
    %c0_24 = arith.constant 0 : index
    %46 = vector.load %arg7[%c176, %c0_24] : memref<384x512xf32, #tpu.memory_space<vmem>>, vector<8x512xf32>
    tpu.vector_store %arg7[%c176, %c0_24], %45 {strides = array<i32>} : memref<384x512xf32, #tpu.memory_space<vmem>>, vector<8x512xf32>,
    %47 = vector.extract_strided_slice %0 {offsets = [0, 23], sizes = [8, 512], strides = [1, 1]} : vector<8x640xf32> to vector<8x512xf32>
    %c184 = arith.constant 184 : index
    %c0_25 = arith.constant 0 : index
    %48 = vector.load %arg7[%c184, %c0_25] : memref<384x512xf32, #tpu.memory_space<vmem>>, vector<8x512xf32>
    tpu.vector_store %arg7[%c184, %c0_25], %47 {strides = array<i32>} : memref<384x512xf32, #tpu.memory_space<vmem>>, vector<8x512xf32>,
    %49 = vector.extract_strided_slice %0 {offsets = [0, 24], sizes = [8, 512], strides = [1, 1]} : vector<8x640xf32> to vector<8x512xf32>
    %c192 = arith.constant 192 : index
    %c0_26 = arith.constant 0 : index
    %50 = vector.load %arg7[%c192, %c0_26] : memref<384x512xf32, #tpu.memory_space<vmem>>, vector<8x512xf32>
    tpu.vector_store %arg7[%c192, %c0_26], %49 {strides = array<i32>} : memref<384x512xf32, #tpu.memory_space<vmem>>, vector<8x512xf32>,
    %51 = vector.extract_strided_slice %0 {offsets = [0, 25], sizes = [8, 512], strides = [1, 1]} : vector<8x640xf32> to vector<8x512xf32>
    %c200 = arith.constant 200 : index
    %c0_27 = arith.constant 0 : index
    %52 = vector.load %arg7[%c200, %c0_27] : memref<384x512xf32, #tpu.memory_space<vmem>>, vector<8x512xf32>
    tpu.vector_store %arg7[%c200, %c0_27], %51 {strides = array<i32>} : memref<384x512xf32, #tpu.memory_space<vmem>>, vector<8x512xf32>,
    %53 = vector.extract_strided_slice %0 {offsets = [0, 26], sizes = [8, 512], strides = [1, 1]} : vector<8x640xf32> to vector<8x512xf32>
    %c208 = arith.constant 208 : index
    %c0_28 = arith.constant 0 : index
    %54 = vector.load %arg7[%c208, %c0_28] : memref<384x512xf32, #tpu.memory_space<vmem>>, vector<8x512xf32>
    tpu.vector_store %arg7[%c208, %c0_28], %53 {strides = array<i32>} : memref<384x512xf32, #tpu.memory_space<vmem>>, vector<8x512xf32>,
    %55 = vector.extract_strided_slice %0 {offsets = [0, 27], sizes = [8, 512], strides = [1, 1]} : vector<8x640xf32> to vector<8x512xf32>
    %c216 = arith.constant 216 : index
    %c0_29 = arith.constant 0 : index
    %56 = vector.load %arg7[%c216, %c0_29] : memref<384x512xf32, #tpu.memory_space<vmem>>, vector<8x512xf32>
    tpu.vector_store %arg7[%c216, %c0_29], %55 {strides = array<i32>} : memref<384x512xf32, #tpu.memory_space<vmem>>, vector<8x512xf32>,
    %57 = vector.extract_strided_slice %0 {offsets = [0, 28], sizes = [8, 512], strides = [1, 1]} : vector<8x640xf32> to vector<8x512xf32>
    %c224 = arith.constant 224 : index
    %c0_30 = arith.constant 0 : index
    %58 = vector.load %arg7[%c224, %c0_30] : memref<384x512xf32, #tpu.memory_space<vmem>>, vector<8x512xf32>
    tpu.vector_store %arg7[%c224, %c0_30], %57 {strides = array<i32>} : memref<384x512xf32, #tpu.memory_space<vmem>>, vector<8x512xf32>,
    %59 = vector.extract_strided_slice %0 {offsets = [0, 29], sizes = [8, 512], strides = [1, 1]} : vector<8x640xf32> to vector<8x512xf32>
    %c232 = arith.constant 232 : index
    %c0_31 = arith.constant 0 : index
    %60 = vector.load %arg7[%c232, %c0_31] : memref<384x512xf32, #tpu.memory_space<vmem>>, vector<8x512xf32>
    tpu.vector_store %arg7[%c232, %c0_31], %59 {strides = array<i32>} : memref<384x512xf32, #tpu.memory_space<vmem>>, vector<8x512xf32>,
    %61 = vector.extract_strided_slice %0 {offsets = [0, 30], sizes = [8, 512], strides = [1, 1]} : vector<8x640xf32> to vector<8x512xf32>
    %c240 = arith.constant 240 : index
    %c0_32 = arith.constant 0 : index
    %62 = vector.load %arg7[%c240, %c0_32] : memref<384x512xf32, #tpu.memory_space<vmem>>, vector<8x512xf32>
    tpu.vector_store %arg7[%c240, %c0_32], %61 {strides = array<i32>} : memref<384x512xf32, #tpu.memory_space<vmem>>, vector<8x512xf32>,
    %63 = vector.extract_strided_slice %0 {offsets = [0, 31], sizes = [8, 512], strides = [1, 1]} : vector<8x640xf32> to vector<8x512xf32>
    %c248 = arith.constant 248 : index
    %c0_33 = arith.constant 0 : index
    %64 = vector.load %arg7[%c248, %c0_33] : memref<384x512xf32, #tpu.memory_space<vmem>>, vector<8x512xf32>
    tpu.vector_store %arg7[%c248, %c0_33], %63 {strides = array<i32>} : memref<384x512xf32, #tpu.memory_space<vmem>>, vector<8x512xf32>,
    %65 = vector.extract_strided_slice %0 {offsets = [0, 32], sizes = [8, 512], strides = [1, 1]} : vector<8x640xf32> to vector<8x512xf32>
    %c256 = arith.constant 256 : index
    %c0_34 = arith.constant 0 : index
    %66 = vector.load %arg7[%c256, %c0_34] : memref<384x512xf32, #tpu.memory_space<vmem>>, vector<8x512xf32>
    tpu.vector_store %arg7[%c256, %c0_34], %65 {strides = array<i32>} : memref<384x512xf32, #tpu.memory_space<vmem>>, vector<8x512xf32>,
    %67 = vector.extract_strided_slice %0 {offsets = [0, 33], sizes = [8, 512], strides = [1, 1]} : vector<8x640xf32> to vector<8x512xf32>
    %c264 = arith.constant 264 : index
    %c0_35 = arith.constant 0 : index
    %68 = vector.load %arg7[%c264, %c0_35] : memref<384x512xf32, #tpu.memory_space<vmem>>, vector<8x512xf32>
    tpu.vector_store %arg7[%c264, %c0_35], %67 {strides = array<i32>} : memref<384x512xf32, #tpu.memory_space<vmem>>, vector<8x512xf32>,
    %69 = vector.extract_strided_slice %0 {offsets = [0, 34], sizes = [8, 512], strides = [1, 1]} : vector<8x640xf32> to vector<8x512xf32>
    %c272 = arith.constant 272 : index
    %c0_36 = arith.constant 0 : index
    %70 = vector.load %arg7[%c272, %c0_36] : memref<384x512xf32, #tpu.memory_space<vmem>>, vector<8x512xf32>
    tpu.vector_store %arg7[%c272, %c0_36], %69 {strides = array<i32>} : memref<384x512xf32, #tpu.memory_space<vmem>>, vector<8x512xf32>,
    %71 = vector.extract_strided_slice %0 {offsets = [0, 35], sizes = [8, 512], strides = [1, 1]} : vector<8x640xf32> to vector<8x512xf32>
    %c280 = arith.constant 280 : index
    %c0_37 = arith.constant 0 : index
    %72 = vector.load %arg7[%c280, %c0_37] : memref<384x512xf32, #tpu.memory_space<vmem>>, vector<8x512xf32>
    tpu.vector_store %arg7[%c280, %c0_37], %71 {strides = array<i32>} : memref<384x512xf32, #tpu.memory_space<vmem>>, vector<8x512xf32>,
    %73 = vector.extract_strided_slice %0 {offsets = [0, 36], sizes = [8, 512], strides = [1, 1]} : vector<8x640xf32> to vector<8x512xf32>
    %c288 = arith.constant 288 : index
    %c0_38 = arith.constant 0 : index
    %74 = vector.load %arg7[%c288, %c0_38] : memref<384x512xf32, #tpu.memory_space<vmem>>, vector<8x512xf32>
    tpu.vector_store %arg7[%c288, %c0_38], %73 {strides = array<i32>} : memref<384x512xf32, #tpu.memory_space<vmem>>, vector<8x512xf32>,
    %75 = vector.extract_strided_slice %0 {offsets = [0, 37], sizes = [8, 512], strides = [1, 1]} : vector<8x640xf32> to vector<8x512xf32>
    %c296 = arith.constant 296 : index
    %c0_39 = arith.constant 0 : index
    %76 = vector.load %arg7[%c296, %c0_39] : memref<384x512xf32, #tpu.memory_space<vmem>>, vector<8x512xf32>
    tpu.vector_store %arg7[%c296, %c0_39], %75 {strides = array<i32>} : memref<384x512xf32, #tpu.memory_space<vmem>>, vector<8x512xf32>,
    %77 = vector.extract_strided_slice %0 {offsets = [0, 38], sizes = [8, 512], strides = [1, 1]} : vector<8x640xf32> to vector<8x512xf32>
    %c304 = arith.constant 304 : index
    %c0_40 = arith.constant 0 : index
    %78 = vector.load %arg7[%c304, %c0_40] : memref<384x512xf32, #tpu.memory_space<vmem>>, vector<8x512xf32>
    tpu.vector_store %arg7[%c304, %c0_40], %77 {strides = array<i32>} : memref<384x512xf32, #tpu.memory_space<vmem>>, vector<8x512xf32>,
    %c0_41 = arith.constant 0 : index
    %c0_42 = arith.constant 0 : index
    %79 = vector.load %arg2[%c0_41, %c0_42] : memref<8x640xf32, #tpu.memory_space<vmem>>, vector<8x640xf32>
    %80 = arith.addf %0, %79 : vector<8x640xf32>
    %81 = vector.extract_strided_slice %80 {offsets = [0, 19], sizes = [8, 512], strides = [1, 1]} : vector<8x640xf32> to vector<8x512xf32>
    %82 = vector.extract_strided_slice %80 {offsets = [0, 18], sizes = [8, 512], strides = [1, 1]} : vector<8x640xf32> to vector<8x512xf32>
    %83 = arith.maximumf %81, %82 : vector<8x512xf32>
    %84 = vector.extract_strided_slice %80 {offsets = [0, 20], sizes = [8, 512], strides = [1, 1]} : vector<8x640xf32> to vector<8x512xf32>
    %85 = arith.maximumf %83, %84 : vector<8x512xf32>
    %c0_43 = arith.constant 0 : index
    %c0_44 = arith.constant 0 : index
    %86 = vector.load %arg3[%c0_43, %c0_44] : memref<8x512xf32, #tpu.memory_space<vmem>>, vector<8x512xf32>
    %87 = arith.mulf %85, %86 : vector<8x512xf32>
    %c312 = arith.constant 312 : index
    %c0_45 = arith.constant 0 : index
    %88 = vector.load %arg7[%c312, %c0_45] : memref<384x512xf32, #tpu.memory_space<vmem>>, vector<8x512xf32>
    tpu.vector_store %arg7[%c312, %c0_45], %87 {strides = array<i32>} : memref<384x512xf32, #tpu.memory_space<vmem>>, vector<8x512xf32>,
    %cst = arith.constant 0.000000e+00 : f32
    %89 = vector.broadcast %cst : f32 to vector<64x512xf32>
    %c320 = arith.constant 320 : index
    %c0_46 = arith.constant 0 : index
    %90 = vector.load %arg7[%c320, %c0_46] : memref<384x512xf32, #tpu.memory_space<vmem>>, vector<64x512xf32>
    tpu.vector_store %arg7[%c320, %c0_46], %89 {strides = array<i32>} : memref<384x512xf32, #tpu.memory_space<vmem>>, vector<64x512xf32>,
    %c0_47 = arith.constant 0 : index
    %c0_48 = arith.constant 0 : index
    %91 = vector.load %arg1[%c0_47, %c0_48] : memref<32x384xf32, #tpu.memory_space<vmem>>, vector<32x384xf32>
    %c0_49 = arith.constant 0 : index
    %c0_50 = arith.constant 0 : index
    %92 = vector.load %arg7[%c0_49, %c0_50] : memref<384x512xf32, #tpu.memory_space<vmem>>, vector<384x512xf32>
    %cst_51 = arith.constant dense<0.000000e+00> : vector<32x512xf32>
    %93 = tpu.matmul %91, %92, %cst_51 {dimension_numbers = #tpu.dot_dimension_numbers<[1], [0], [0], [1], [0, 0, 1, 1], [], []>} : vector<32x384xf32>, vector<384x512xf32>, vector<32x512xf32> -> vector<32x512xf32>
    %94 = vector.extract_strided_slice %93 {offsets = [0, 128], sizes = [32, 128], strides = [1, 1]} : vector<32x512xf32> to vector<32x128xf32>
    %c0_52 = arith.constant 0 : index
    %c0_53 = arith.constant 0 : index
    %95 = vector.load %arg6[%c0_52, %c0_53] : memref<32x256xf32, #tpu.memory_space<vmem>>, vector<32x128xf32>
    tpu.vector_store %arg6[%c0_52, %c0_53], %94 {strides = array<i32>} : memref<32x256xf32, #tpu.memory_space<vmem>>, vector<32x128xf32>,
    %96 = vector.extract_strided_slice %93 {offsets = [0, 384], sizes = [32, 128], strides = [1, 1]} : vector<32x512xf32> to vector<32x128xf32>
    %c0_54 = arith.constant 0 : index
    %c128_55 = arith.constant 128 : index
    %97 = vector.load %arg6[%c0_54, %c128_55] : memref<32x256xf32, #tpu.memory_space<vmem>>, vector<32x128xf32>
    tpu.vector_store %arg6[%c0_54, %c128_55], %96 {strides = array<i32>} : memref<32x256xf32, #tpu.memory_space<vmem>>, vector<32x128xf32>,
    %c0_56 = arith.constant 0 : index
    %c0_57 = arith.constant 0 : index
    %98 = vector.load %arg6[%c0_56, %c0_57] : memref<32x256xf32, #tpu.memory_space<vmem>>, vector<32x256xf32>
    %cst_58 = arith.constant dense<0.000000e+00> : vector<32xf32>
    %99 = vector.multi_reduction <add>, %98, %cst_58 [1] : vector<32x256xf32> to vector<32xf32>
    %100 = vector.shape_cast %99 : vector<32xf32> to vector<32x1xf32>
    %cst_59 = arith.constant 3.906250e-03 : f32
    %101 = vector.broadcast %cst_59 : f32 to vector<32x1xf32>
    %102 = arith.mulf %100, %101 : vector<32x1xf32>
    %103 = arith.mulf %98, %98 : vector<32x256xf32>
    %cst_60 = arith.constant dense<0.000000e+00> : vector<32xf32>
    %104 = vector.multi_reduction <add>, %103, %cst_60 [1] : vector<32x256xf32> to vector<32xf32>
    %105 = vector.shape_cast %104 : vector<32xf32> to vector<32x1xf32>
    %cst_61 = arith.constant 3.906250e-03 : f32
    %106 = vector.broadcast %cst_61 : f32 to vector<32x1xf32>
    %107 = arith.mulf %105, %106 : vector<32x1xf32>
    %108 = arith.mulf %102, %102 : vector<32x1xf32>
    %109 = arith.subf %107, %108 : vector<32x1xf32>
    %cst_62 = arith.constant 9.99999974E-6 : f32
    %110 = vector.broadcast %cst_62 : f32 to vector<32x1xf32>
    %111 = arith.addf %109, %110 : vector<32x1xf32>
    %112 = math.rsqrt %111 : vector<32x1xf32>
    %c0_63 = arith.constant 0 : index
    %c0_64 = arith.constant 0 : index
    %113 = vector.load %arg4[%c0_63, %c0_64] : memref<32x1xf32, #tpu.memory_space<vmem>>, vector<32x1xf32>
    %114 = arith.mulf %112, %113 : vector<32x1xf32>
    %c0_65 = arith.constant 0 : index
    %c0_66 = arith.constant 0 : index
    %115 = vector.load %arg5[%c0_65, %c0_66] : memref<32x1xf32, #tpu.memory_space<vmem>>, vector<32x1xf32>
    %116 = arith.mulf %102, %114 : vector<32x1xf32>
    %117 = arith.subf %115, %116 : vector<32x1xf32>
    %118 = vector.broadcast %114 : vector<32x1xf32> to vector<32x256xf32>
    %119 = arith.mulf %98, %118 : vector<32x256xf32>
    %120 = vector.broadcast %117 : vector<32x1xf32> to vector<32x256xf32>
    %121 = arith.addf %119, %120 : vector<32x256xf32>
    %cst_67 = arith.constant 0.000000e+00 : f32
    %122 = vector.broadcast %cst_67 : f32 to vector<32x256xf32>
    %123 = arith.cmpf ogt, %121, %122 : vector<32x256xf32>
    %cst_68 = arith.constant 0.000000e+00 : f32
    %124 = vector.broadcast %cst_68 : f32 to vector<32x256xf32>
    %125 = arith.minimumf %121, %124 : vector<32x256xf32>
    %126 = math.exp %125 : vector<32x256xf32>
    %cst_69 = arith.constant 1.000000e+00 : f32
    %127 = vector.broadcast %cst_69 : f32 to vector<32x256xf32>
    %128 = arith.subf %126, %127 : vector<32x256xf32>
    %cst_70 = arith.constant 1.67326319 : f32
    %129 = vector.broadcast %cst_70 : f32 to vector<32x256xf32>
    %130 = arith.mulf %129, %128 : vector<32x256xf32>
    %131 = arith.select %123, %121, %130 : vector<32x256xi1>, vector<32x256xf32>
    %cst_71 = arith.constant 1.05070102 : f32
    %132 = vector.broadcast %cst_71 : f32 to vector<32x256xf32>
    %133 = arith.mulf %132, %131 : vector<32x256xf32>
    %c0_72 = arith.constant 0 : index
    %c0_73 = arith.constant 0 : index
    %134 = vector.load %arg6[%c0_72, %c0_73] : memref<32x256xf32, #tpu.memory_space<vmem>>, vector<32x256xf32>
    tpu.vector_store %arg6[%c0_72, %c0_73], %133 {strides = array<i32>} : memref<32x256xf32, #tpu.memory_space<vmem>>, vector<32x256xf32>,
    return
  }
}

</mosaic_0001>

<bundles_post_ra>
// kernel: tpu_custom_call.1
= control target key start
LH: loop header
LB: loop body
LE: loop exit
PB: predicated region body
PF: predicated region fallthrough
CT: control target
= control target key end

     0   :  { %11 = vsyncpa [#allocation4], 0  ;;  %s3286_s0 = inlined_call_operand.vmem [shape: f32[8,640], index: 0, kind: input, shape index: {}]   ;;  %s3287_s1 = inlined_call_operand.hbm [shape: f32[32,384], index: 1, kind: input, shape index: {}]   ;;  %s3288_s2 = inlined_call_operand.hbm [shape: f32[8,640], index: 2, kind: input, shape index: {}]   ;;  %s3289_s3 = inlined_call_operand.vmem [shape: f32[8,512], index: 3, kind: input, shape index: {}]   ;;  %s3290_s4 = inlined_call_operand.vmem [shape: f32[32,1], index: 4, kind: input, shape index: {}]   ;;  %s3291_s5 = inlined_call_operand.vmem [shape: f32[32,1], index: 5, kind: input, shape index: {}]   ;;  %s3292_s6 = inlined_call_operand.hbm [shape: f32[32,256], index: 6, kind: output, shape index: {}]  }
   0x1   :  { %12 = vsyncpa [#allocation7], 0 }
   0x2   :  { %13 = vsyncpa [#allocation5], 0  ;;  %s2599_s21 = smov [#allocation3]   ;;  %s2527_s25 = scalar_lea.hbm %s3287_s1, 1536 }
   0x3   :  { %s21_s22 = sshll.u32 %s2599_s21, 4  ;;  %p2528_p0 = scmp.ne.s32.totalorder %s3287_s1, %s2527_s25  ;;  %s22_s22 = int_to_ptr.vmem [resolvable:$true] %s21_s22 }
   0x4   :  { %p2531_p1 = scmp.lt.u32.totalorder %s2527_s25, %s3287_s1 }
   0x6   :  { %p2533_p2 = pnand %p2531_p1, %p2528_p0 }
   0x8   :  { %2536 = shalt.err (!%p2533_p2)
}
   0x9   :  { %s2537_s30 = scalar_lea.vmem %s22_s22, 1536  ;;  %p2542_p4 = scmp.lt.s32.totalorder %s22_s22, %s22_s22 }
   0xa   :  { %p2538_p3 = scmp.ne.s32.totalorder %s22_s22, %s2537_s30  ;;  %p2543_p5 = scmp.lt.s32.totalorder %s2537_s30, %s2537_s30 }
   0xc   :  { %p2544_p6 = por %p2543_p5, %p2542_p4 }
   0xe   :  { %p2545_p7 = pnand %p2544_p6, %p2538_p3 }
  0x10   :  { %2548 = shalt.err (!%p2545_p7)
}
  0x11   :  { %s2600_s7 = smov 384   ;;  %s2601_s8 = smov 24  }
  0x12   :  { %27 = dma.hbm_to_vmem [thread:$0]  %s3287_s1, 1536, %s22_s22, [#allocation4], %s2600_s7, %s2600_s7, %s2601_s8  }
  0x13   :  { %s2602_s11 = smov [#allocation6]   ;;  %s2549_s15 = scalar_lea.hbm %s3288_s2, 640 }
  0x14   :  { %s34_s12 = sshll.u32 %s2602_s11, 4  ;;  %p2550_p8 = scmp.ne.s32.totalorder %s3288_s2, %s2549_s15  ;;  %s35_s12 = int_to_ptr.vmem [resolvable:$true] %s34_s12 }
  0x15   :  { %p2553_p9 = scmp.lt.u32.totalorder %s2549_s15, %s3288_s2 }
  0x17   :  { %p2555_p10 = pnand %p2553_p9, %p2550_p8 }
  0x19   :  { %2558 = shalt.err (!%p2555_p10)
}
  0x1a   :  { %s2559_s20 = scalar_lea.vmem %s35_s12, 640  ;;  %p2564_p12 = scmp.lt.s32.totalorder %s35_s12, %s35_s12 }
  0x1b   :  { %p2560_p11 = scmp.ne.s32.totalorder %s35_s12, %s2559_s20  ;;  %p2565_p13 = scmp.lt.s32.totalorder %s2559_s20, %s2559_s20 }
  0x1d   :  { %p2566_p0 = por %p2565_p13, %p2564_p12 }
  0x1f   :  { %p2567_p1 = pnand %p2566_p0, %p2560_p11 }
  0x21   :  { %2570 = shalt.err (!%p2567_p1)
}
  0x22   :  { %37 = dma.hbm_to_vmem [thread:$0]  %s3288_s2, 640, %s35_s12, [#allocation7]  }
  0x23   :  { %2593 = dma.done.wait [#allocation4], 1536  }
  0x24   :  { %2594 = vsyncadd [#allocation4], 4294965760 }
  0x25   :  { %2595 = dma.done.wait [#allocation7], 640  }
  0x26   :  { %2596 = vsyncadd [#allocation7], 4294966656  ;;  %v2710_v0 = vld [vmem:[%s3286_s0] sm:$0xff]  ;;  %v2715_v1 = vld [vmem:[%s3286_s0 + $0x8] sm:$0xff]  ;;  %s2603_s2 = smov 127   ;;  %s2604_s8 = smov 126  }
  0x27   :  { %v2720_v2 = vld [vmem:[%s3286_s0 + $0x10] sm:$0xff]  ;;  %64 = vrot.lane.b32.xlu1 %v2710_v0, %s2603_s2  ;;  %v2731_v4 = vld [vmem:[%s3286_s0 + $0x18] sm:$0xff]  ;;  %v54_v5 = vld [vmem:[%s3286_s0 + $0x20] sm:$0xff]  ;;  %s2605_s9 = smov 125   ;;  %s2606_s10 = smov 124   ;;  %vm74_vm0 = vcmask 1039360  }
  0x28   :  { %v2726_v3 = vpack.i.bf16 %v2720_v2, %v2715_v1  ;;  %v2739_v6 = vpack.i.bf16 %v54_v5, %v2731_v4  ;;  %s2607_s11 = smov 123   ;;  %v938_v7 = vld [vmem:[#allocation6] sm:$0xff]  ;;  %v940_v9 = vld [vmem:[#allocation6 + $0x10] sm:$0xff]  ;;  %v939_v10 = vld [vmem:[#allocation6 + $0x8] sm:$0xff]  ;;  %s2608_s12 = smov 1   ;;  %vm97_vm1 = vcmask 1031168  }
  0x29   :  { %v2754_v8 = vadd.f32 %v938_v7, %v2710_v0  ;;  %v2759_v11 = vadd.f32 %v940_v9, %v2720_v2  ;;  %v942_v12 = vld [vmem:[#allocation6 + $0x20] sm:$0xff]  ;;  %v2763_v13 = vadd.f32 %v939_v10, %v2715_v1  ;;  %v941_v14 = vld [vmem:[#allocation6 + $0x18] sm:$0xff]  ;;  %s2609_s13 = smov 122   ;;  %s2610_s14 = smov 121   ;;  %v1004_v18 = vld [vmem:[%s3289_s3 + $0x10] sm:$0xff]  ;;  %vm120_vm2 = vcmask 1022976  }
  0x2a   :  { %2107 = vrot.lane.b32.xlu0 %v2726_v3, %s2603_s2  ;;  %v2766_v15 = vadd.f32 %v942_v12, %v54_v5  ;;  %v2770_v16 = vadd.f32 %v941_v14, %v2731_v4  ;;  %v1002_v17 = vld [vmem:[%s3289_s3] sm:$0xff]  ;;  %s2611_s17 = smov 19   ;;  %v1003_v19 = vld [vmem:[%s3289_s3 + $0x8] sm:$0xff]  ;;  %v1005_v20 = vld [vmem:[%s3289_s3 + $0x18] sm:$0xff]  ;;  %s2612_s23 = smov 120   ;;  %vm143_vm3 = vcmask 1014784  }
  0x2b   :  { %2117 = vrot.lane.b32.xlu1 %v2726_v3, %s2604_s8  ;;  %s2613_s24 = smov 119   ;;  %s2614_s25 = smov 118   ;;  %vm166_vm4 = vcmask 1006592   ;;  %vm212_vm5 = vcmask 990208   ;;  %vm189_vm6 = vcmask 998400   ;;  %vm235_vm7 = vcmask 982016  }
  0x2c   :  { %s2615_s26 = smov 117   ;;  %s2616_s3 = smov 116   ;;  %vm258_vm8 = vcmask 973824   ;;  %vm281_vm9 = vcmask 965632   ;;  %vm304_vm10 = vcmask 957440   ;;  %vm327_vm11 = vcmask 949248  }
  0x2d   :  { %s2617_s27 = smov 115   ;;  %s2619_s28 = smov 113   ;;  %vm350_vm12 = vcmask 941056   ;;  %vm373_vm13 = vcmask 932864   ;;  %vm396_vm14 = vcmask 924672   ;;  %vm419_vm15 = vcmask 916480  }
  0x2e   :  { %2112 = vrot.lane.b32.xlu0 %v2739_v6, %s2603_s2  ;;  %s2620_s29 = smov 112   ;;  %s2621_s30 = smov 111  }
  0x2f   :  { %2127 = vrot.lane.b32.xlu1 %v2726_v3, %s2605_s9  ;;  %s2622_s7 = smov 110   ;;  %s2630_s15 = smov 102  }
  0x30   :  { %s2631_s16 = smov 101   ;;  %s2633_s18 = smov 99  }
  0x31   :  { %s2634_s19 = smov 98   ;;  %s2635_s20 = smov 97  }
  0x32   :  { %2122 = vrot.lane.b32.xlu0 %v2739_v6, %s2604_s8  ;;  %s2636_s1 = smov 96   ;;  %s2637_s21 = smov 95  }
  0x33   :  { %87 = vrot.lane.b32.xlu1 %v2710_v0, %s2604_s8  ;;  %s2623_s8 = smov 109   ;;  %s2638_s22 = smov 94  }
  0x36   :  { %2132 = vrot.lane.b32.xlu0 %v2739_v6, %s2605_s9 }
  0x37   :  { %2137 = vrot.lane.b32.xlu1 %v2726_v3, %s2606_s10 }
  0x3a   :  { %110 = vrot.lane.b32.xlu0 %v2710_v0, %s2605_s9  ;;  %s2624_s9 = smov 108  }
  0x3b   :  { %2147 = vrot.lane.b32.xlu1 %v2726_v3, %s2607_s11 }
  0x3e   :  { %2142 = vrot.lane.b32.xlu0 %v2739_v6, %s2606_s10 }
  0x3f   :  { %133 = vrot.lane.b32.xlu1 %v2710_v0, %s2606_s10  ;;  %s2625_s10 = smov 107  }
  0x42   :  { %2152 = vrot.lane.b32.xlu0 %v2739_v6, %s2607_s11 }
  0x43   :  { %953 = vrot.lane.b32.xlu1 %v2754_v8, %s2608_s12 }
  0x46   :  { %156 = vrot.lane.b32.xlu0 %v2710_v0, %s2607_s11  ;;  %s2626_s11 = smov 106  }
  0x47   :  { %957 = vrot.lane.b32.xlu1 %v2759_v11, %s2608_s12 }
  0x4a   :  { %955 = vrot.lane.b32.xlu0 %v2763_v13, %s2608_s12 }
  0x4b   :  { %961 = vrot.lane.b32.xlu1 %v2766_v15, %s2608_s12 }
  0x4e   :  { %959 = vrot.lane.b32.xlu0 %v2770_v16, %s2608_s12  ;;  %s2627_s12 = smov 105  }
  0x4f   :  { %2162 = vrot.lane.b32.xlu1 %v2739_v6, %s2609_s13 }
  0x52   :  { %2157 = vrot.lane.b32.xlu0 %v2726_v3, %s2609_s13 }
  0x53   :  { %2172 = vrot.lane.b32.xlu1 %v2739_v6, %s2610_s14 }
  0x56   :  { %2167 = vrot.lane.b32.xlu0 %v2726_v3, %s2610_s14 }
  0x57   :  { %202 = vrot.lane.b32.xlu1 %v2710_v0, %s2610_s14  ;;  %s2629_s14 = smov 103  }
  0x5a   :  { %179 = vrot.lane.b32.xlu0 %v2710_v0, %s2609_s13  ;;  %s2628_s13 = smov 104  }
  0x5b   :  { %982 = vrot.lane.b32.xlu1 %v2759_v11, %s2603_s2 }
  0x5e   :  { %980 = vrot.lane.b32.xlu0 %v2763_v13, %s2603_s2 }
  0x5f   :  { %986 = vrot.lane.b32.xlu1 %v2766_v15, %s2603_s2 }
  0x62   :  { %984 = vrot.lane.b32.xlu0 %v2770_v16, %s2603_s2 }
  0x63   :  { %1010 = vrot.lane.b32.xlu1 %v1002_v17, %s2611_s17 }
  0x66   :  { %978 = vrot.lane.b32.xlu0 %v2754_v8, %s2603_s2  ;;  %s2618_s2 = smov 114  }
  0x67   :  { %1014 = vrot.lane.b32.xlu1 %v1004_v18, %s2611_s17 }
  0x6a   :  { %1012 = vrot.lane.b32.xlu0 %v1003_v19, %s2611_s17 }
  0x6b   :  { %2177 = vrot.lane.b32.xlu1 %v2726_v3, %s2612_s23 }
  0x6e   :  { %1016 = vrot.lane.b32.xlu0 %v1005_v20, %s2611_s17  ;;  %s2632_s17 = smov 100  }
  0x6f   :  { %2187 = vrot.lane.b32.xlu1 %v2726_v3, %s2613_s24 }
  0x72   :  { %2182 = vrot.lane.b32.xlu0 %v2739_v6, %s2612_s23 }
  0x73   :  { %225 = vrot.lane.b32.xlu1 %v2710_v0, %s2612_s23  ;;  %s2639_s23 = smov 93  }
  0x76   :  { %2192 = vrot.lane.b32.xlu0 %v2739_v6, %s2613_s24 }
  0x77   :  { %2197 = vrot.lane.b32.xlu1 %v2726_v3, %s2614_s25 }
  0x7a   :  { %248 = vrot.lane.b32.xlu0 %v2710_v0, %s2613_s24  ;;  %s2640_s24 = smov 92  }
  0x7b   :  { %2207 = vrot.lane.b32.xlu1 %v2726_v3, %s2615_s26 }
  0x7e   :  { %2202 = vrot.lane.b32.xlu0 %v2739_v6, %s2614_s25 }
  0x7f   :  { %271 = vrot.lane.b32.xlu1 %v2710_v0, %s2614_s25 }
  0x82   :  { %2212 = vrot.lane.b32.xlu0 %v2739_v6, %s2615_s26 }
  0x83   :  { %2217 = vrot.lane.b32.xlu1 %v2726_v3, %s2616_s3 }
  0x86   :  { %294 = vrot.lane.b32.xlu0 %v2710_v0, %s2615_s26 }
  0x87   :  { %2227 = vrot.lane.b32.xlu1 %v2726_v3, %s2617_s27 }
  0x8a   :  { %2222 = vrot.lane.b32.xlu0 %v2739_v6, %s2616_s3 }
  0x8b   :  { %317 = vrot.lane.b32.xlu1 %v2710_v0, %s2616_s3 }
  0x8e   :  { %2232 = vrot.lane.b32.xlu0 %v2739_v6, %s2617_s27 }
  0x8f   :  { %2237 = vrot.lane.b32.xlu1 %v2726_v3, %s2618_s2 }
  0x92   :  { %340 = vrot.lane.b32.xlu0 %v2710_v0, %s2617_s27 }
  0x93   :  { %2247 = vrot.lane.b32.xlu1 %v2726_v3, %s2619_s28 }
  0x96   :  { %2242 = vrot.lane.b32.xlu0 %v2739_v6, %s2618_s2 }
  0x97   :  { %363 = vrot.lane.b32.xlu1 %v2710_v0, %s2618_s2 }
  0x99   :  { %v65_v21 = vpop.permute.xlu1 %64 }
  0x9a   :  { %2252 = vrot.lane.b32.xlu0 %v2739_v6, %s2619_s28 }
  0x9b   :  { %2257 = vrot.lane.b32.xlu1 %v2726_v3, %s2620_s29 }
  0x9c   :  { %v2108_v22 = vpop.permute.xlu0 %2107 }
  0x9d   :  { %v2110_v23 = vunpack.i.h.bf16 %v2108_v22  ;;  %v2109_v24 = vunpack.i.l.bf16 %v2108_v22  ;;  %v2118_v25 = vpop.permute.xlu1 %2117 }
  0x9e   :  { %386 = vrot.lane.b32.xlu0 %v2710_v0, %s2619_s28  ;;  %v2120_v26 = vunpack.i.h.bf16 %v2118_v25  ;;  %v2119_v27 = vunpack.i.l.bf16 %v2118_v25 }
  0x9f   :  { %v76_v28 = vsel %vm74_vm0, %v2109_v24, %v2110_v23  ;;  %v75_v29 = vsel %vm74_vm0, %v65_v21, %v2109_v24  ;;  %2267 = vrot.lane.b32.xlu1 %v2726_v3, %s2621_s30 }
  0xa0   :  { %v2113_v30 = vpop.permute.xlu0 %2112  ;;  %v1881_v31 = vpack.c.bf16 %v76_v28, %v2715_v1  ;;  %v1883_v32 = vpack.c.bf16 %v75_v29, %v2710_v0  ;;  %v99_v36 = vsel %vm97_vm1, %v2119_v27, %v2120_v26 }
  0xa1   :  { %v2115_v33 = vunpack.i.h.bf16 %v2113_v30  ;;  %v2114_v34 = vunpack.i.l.bf16 %v2113_v30  ;;  %v2128_v35 = vpop.permute.xlu1 %2127 }
  0xa2   :  { %1882 = vmatprep.subr.bf16.mxu0 %v1881_v31  ;;  %2262 = vrot.lane.b32.xlu0 %v2739_v6, %s2620_s29  ;;  %v2130_v37 = vunpack.i.h.bf16 %v2128_v35  ;;  %v2129_v38 = vunpack.i.l.bf16 %v2128_v35 }
  0xa3   :  { %1884 = vmatpush1.bf16.msra.mxu0 %v1883_v32  ;;  %v78_v39 = vsel %vm74_vm0, %v2114_v34, %v2115_v33  ;;  %v77_v40 = vsel %vm74_vm0, %v2110_v23, %v2114_v34  ;;  %409 = vrot.lane.b32.xlu1 %v2710_v0, %s2620_s29 }
  0xa4   :  { %v2123_v41 = vpop.permute.xlu0 %2122  ;;  %v1961_v42 = vpack.c.bf16 %v78_v39, %v2731_v4  ;;  %v1963_v43 = vpack.c.bf16 %v77_v40, %v2720_v2  ;;  %v122_v44 = vsel %vm120_vm2, %v2129_v38, %v2130_v37 }
  0xa5   :  { %v2125_v45 = vunpack.i.h.bf16 %v2123_v41  ;;  %v2124_v46 = vunpack.i.l.bf16 %v2123_v41  ;;  %v88_v47 = vpop.permute.xlu1 %87  ;;  %v1885_v48 = vpack.c.bf16 %v122_v44, %v99_v36 }
  0xa6   :  { %1962 = vmatprep.subr.bf16.mxu1 %v1961_v42  ;;  %2272 = vrot.lane.b32.xlu0 %v2739_v6, %s2621_s30  ;;  %v98_v62 = vsel %vm97_vm1, %v88_v47, %v2119_v27 }
  0xa7   :  { %1964 = vmatpush1.bf16.msra.mxu1 %v1963_v43  ;;  %2277 = vrot.lane.b32.xlu1 %v2726_v3, %s2622_s7  ;;  %v101_v53 = vsel %vm97_vm1, %v2124_v46, %v2125_v45  ;;  %v100_v54 = vsel %vm97_vm1, %v2120_v26, %v2124_v46  ;;  %vm963_vm1 = vcmask 7168  }
  0xa8   :  { %v2133_v49 = vpop.permute.xlu0 %2132  ;;  %1886 = vmatprep.subr.bf16.mxu0 %v1885_v48 }
  0xa9   :  { %v2135_v50 = vunpack.i.h.bf16 %v2133_v49  ;;  %v2134_v51 = vunpack.i.l.bf16 %v2133_v49  ;;  %v2138_v52 = vpop.permute.xlu1 %2137 }
  0xaa   :  { %432 = vrot.lane.b32.xlu0 %v2710_v0, %s2621_s30  ;;  %v2140_v55 = vunpack.i.h.bf16 %v2138_v52  ;;  %v2139_v56 = vunpack.i.l.bf16 %v2138_v52 }
  0xab   :  { %v124_v57 = vsel %vm120_vm2, %v2134_v51, %v2135_v50  ;;  %v123_v58 = vsel %vm120_vm2, %v2130_v37, %v2134_v51  ;;  %2287 = vrot.lane.b32.xlu1 %v2726_v3, %s2623_s8 }
  0xac   :  { %v111_v59 = vpop.permute.xlu0 %110  ;;  %v1965_v60 = vpack.c.bf16 %v124_v57, %v101_v53  ;;  %v1967_v61 = vpack.c.bf16 %v123_v58, %v100_v54  ;;  %v145_v7 = vsel %vm143_vm3, %v2139_v56, %v2140_v55 }
  0xad   :  { %v121_v63 = vsel %vm120_vm2, %v111_v59, %v2129_v38  ;;  %v2148_v2 = vpop.permute.xlu1 %2147  ;;  %vm442_vm2 = vcmask 908288  }
  0xae   :  { %v1887_v1 = vpack.c.bf16 %v121_v63, %v98_v62  ;;  %1966 = vmatprep.subr.bf16.mxu1 %v1965_v60  ;;  %2282 = vrot.lane.b32.xlu0 %v2739_v6, %s2622_s7  ;;  %v2150_v4 = vunpack.i.h.bf16 %v2148_v2  ;;  %v2149_v5 = vunpack.i.l.bf16 %v2148_v2 }
  0xaf   :  { %1968 = vmatpush1.bf16.msra.mxu1 %v1967_v61  ;;  %455 = vrot.lane.b32.xlu1 %v2710_v0, %s2622_s7 }
  0xb0   :  { %v2143_v9 = vpop.permute.xlu0 %2142  ;;  %1888 = vmatpush1.bf16.msra.mxu0 %v1887_v1  ;;  %v168_v10 = vsel %vm166_vm4, %v2149_v5, %v2150_v4 }
  0xb1   :  { %v134_v12 = vpop.permute.xlu1 %133  ;;  %v1889_v14 = vpack.c.bf16 %v168_v10, %v145_v7  ;;  %v2145_v17 = vunpack.i.h.bf16 %v2143_v9  ;;  %v2144_v18 = vunpack.i.l.bf16 %v2143_v9 }
  0xb2   :  { %2292 = vrot.lane.b32.xlu0 %v2739_v6, %s2623_s8  ;;  %v144_v30 = vsel %vm143_vm3, %v134_v12, %v2139_v56 }
  0xb3   :  { %2297 = vrot.lane.b32.xlu1 %v2726_v3, %s2624_s9  ;;  %1890 = vmatprep.subr.bf16.mxu0 %v1889_v14  ;;  %v147_v23 = vsel %vm143_vm3, %v2144_v18, %v2145_v17  ;;  %v146_v25 = vsel %vm143_vm3, %v2140_v55, %v2144_v18  ;;  %vm1018_vm3 = vcmask 154624  }
  0xb4   :  { %v2153_v19 = vpop.permute.xlu0 %2152 }
  0xb5   :  { %v2155_v20 = vunpack.i.h.bf16 %v2153_v19  ;;  %v2154_v21 = vunpack.i.l.bf16 %v2153_v19  ;;  %v2866_v22 = vpop.permute.xlu1 %953 }
  0xb6   :  { %478 = vrot.lane.b32.xlu0 %v2710_v0, %s2623_s8 }
  0xb7   :  { %v170_v24 = vsel %vm166_vm4, %v2154_v21, %v2155_v20  ;;  %v169_v26 = vsel %vm166_vm4, %v2150_v4, %v2154_v21  ;;  %2307 = vrot.lane.b32.xlu1 %v2726_v3, %s2625_s10 }
  0xb8   :  { %v157_v27 = vpop.permute.xlu0 %156  ;;  %v1969_v28 = vpack.c.bf16 %v170_v24, %v147_v23  ;;  %v1971_v29 = vpack.c.bf16 %v169_v26, %v146_v25 }
  0xb9   :  { %v167_v31 = vsel %vm166_vm4, %v157_v27, %v2149_v5  ;;  %v2876_v33 = vpop.permute.xlu1 %957  ;;  %vm465_vm4 = vcmask 900096  }
  0xba   :  { %v1891_v32 = vpack.c.bf16 %v167_v31, %v144_v30  ;;  %1970 = vmatprep.subr.bf16.mxu1 %v1969_v28  ;;  %2302 = vrot.lane.b32.xlu0 %v2739_v6, %s2624_s9 }
  0xbb   :  { %1972 = vmatpush1.bf16.msra.mxu1 %v1971_v29  ;;  %501 = vrot.lane.b32.xlu1 %v2710_v0, %s2624_s9 }
  0xbc   :  { %v2878_v34 = vpop.permute.xlu0 %955  ;;  %1892 = vmatpush1.bf16.msra.mxu0 %v1891_v32 }
  0xbd   :  { %v2882_v35 = vpop.permute.xlu1 %961 }
  0xbe   :  { %2312 = vrot.lane.b32.xlu0 %v2739_v6, %s2625_s10 }
  0xbf   :  { %2317 = vrot.lane.b32.xlu1 %v2726_v3, %s2626_s11 }
  0xc0   :  { %v2884_v36 = vpop.permute.xlu0 %959 }
  0xc1   :  { %v2163_v37 = vpop.permute.xlu1 %2162 }
  0xc2   :  { %524 = vrot.lane.b32.xlu0 %v2710_v0, %s2625_s10  ;;  %v2165_v38 = vunpack.i.h.bf16 %v2163_v37  ;;  %v2164_v40 = vunpack.i.l.bf16 %v2163_v37  ;;  %s2641_s10 = smov 91  }
  0xc3   :  { %2327 = vrot.lane.b32.xlu1 %v2726_v3, %s2627_s12 }
  0xc4   :  { %v2158_v39 = vpop.permute.xlu0 %2157  ;;  %v193_v46 = vsel %vm189_vm6, %v2164_v40, %v2165_v38 }
  0xc5   :  { %v2160_v41 = vunpack.i.h.bf16 %v2158_v39  ;;  %v2173_v42 = vpop.permute.xlu1 %2172  ;;  %v2159_v43 = vunpack.i.l.bf16 %v2158_v39 }
  0xc6   :  { %2322 = vrot.lane.b32.xlu0 %v2739_v6, %s2626_s11  ;;  %v2175_v44 = vunpack.i.h.bf16 %v2173_v42  ;;  %v2174_v45 = vunpack.i.l.bf16 %v2173_v42 }
  0xc7   :  { %547 = vrot.lane.b32.xlu1 %v2710_v0, %s2626_s11  ;;  %v191_v53 = vsel %vm189_vm6, %v2159_v43, %v2160_v41  ;;  %v192_v55 = vsel %vm189_vm6, %v2160_v41, %v2164_v40 }
  0xc8   :  { %v2168_v47 = vpop.permute.xlu0 %2167  ;;  %v216_v50 = vsel %vm212_vm5, %v2174_v45, %v2175_v44 }
  0xc9   :  { %v2170_v48 = vunpack.i.h.bf16 %v2168_v47  ;;  %v2169_v49 = vunpack.i.l.bf16 %v2168_v47  ;;  %v203_v51 = vpop.permute.xlu1 %202  ;;  %v1973_v52 = vpack.c.bf16 %v216_v50, %v193_v46 }
  0xca   :  { %2332 = vrot.lane.b32.xlu0 %v2739_v6, %s2627_s12 }
  0xcb   :  { %v214_v54 = vsel %vm212_vm5, %v2169_v49, %v2170_v48  ;;  %v215_v56 = vsel %vm212_vm5, %v2170_v48, %v2174_v45  ;;  %2337 = vrot.lane.b32.xlu1 %v2726_v3, %s2628_s13  ;;  %1974 = vmatprep.subr.bf16.mxu1 %v1973_v52  ;;  %v213_v60 = vsel %vm212_vm5, %v203_v51, %v2169_v49  ;;  %vm488_vm5 = vcmask 891904  }
  0xcc   :  { %v180_v57 = vpop.permute.xlu0 %179  ;;  %v1893_v58 = vpack.c.bf16 %v214_v54, %v191_v53  ;;  %v1975_v59 = vpack.c.bf16 %v215_v56, %v192_v55 }
  0xcd   :  { %v190_v61 = vsel %vm189_vm6, %v180_v57, %v2159_v43  ;;  %v2905_v63 = vpop.permute.xlu1 %982  ;;  %vm511_vm6 = vcmask 883712  }
  0xce   :  { %v1895_v62 = vpack.c.bf16 %v213_v60, %v190_v61  ;;  %1894 = vmatprep.subr.bf16.mxu0 %v1893_v58  ;;  %570 = vrot.lane.b32.xlu0 %v2710_v0, %s2627_s12 }
  0xcf   :  { %1976 = vmatpush1.bf16.msra.mxu1 %v1975_v59  ;;  %2347 = vrot.lane.b32.xlu1 %v2726_v3, %s2629_s14 }
  0xd0   :  { %v2907_v1 = vpop.permute.xlu0 %980  ;;  %1896 = vmatpush1.bf16.msra.mxu0 %v1895_v62 }
  0xd1   :  { %v2911_v2 = vpop.permute.xlu1 %986 }
  0xd2   :  { %2342 = vrot.lane.b32.xlu0 %v2739_v6, %s2628_s13 }
  0xd3   :  { %593 = vrot.lane.b32.xlu1 %v2710_v0, %s2628_s13 }
  0xd4   :  { %v2913_v4 = vpop.permute.xlu0 %984 }
  0xd5   :  { %v2917_v5 = vpop.permute.xlu1 %1010 }
  0xd6   :  { %2352 = vrot.lane.b32.xlu0 %v2739_v6, %s2629_s14 }
  0xd7   :  { %2357 = vrot.lane.b32.xlu1 %v2726_v3, %s2630_s15 }
  0xd8   :  { %v2919_v7 = vpop.permute.xlu0 %978 }
  0xd9   :  { %v2923_v9 = vpop.permute.xlu1 %1014 }
  0xda   :  { %616 = vrot.lane.b32.xlu0 %v2710_v0, %s2629_s14 }
  0xdb   :  { %2367 = vrot.lane.b32.xlu1 %v2726_v3, %s2631_s16 }
  0xdc   :  { %v2925_v10 = vpop.permute.xlu0 %1012 }
  0xdd   :  { %v2178_v12 = vpop.permute.xlu1 %2177 }
  0xde   :  { %2362 = vrot.lane.b32.xlu0 %v2739_v6, %s2630_s15  ;;  %v2180_v14 = vunpack.i.h.bf16 %v2178_v12  ;;  %v2179_v17 = vunpack.i.l.bf16 %v2178_v12 }
  0xdf   :  { %639 = vrot.lane.b32.xlu1 %v2710_v0, %s2630_s15 }
  0xe0   :  { %v2929_v18 = vpop.permute.xlu0 %1016  ;;  %v237_v23 = vsel %vm235_vm7, %v2179_v17, %v2180_v14 }
  0xe1   :  { %v2188_v19 = vpop.permute.xlu1 %2187 }
  0xe2   :  { %2372 = vrot.lane.b32.xlu0 %v2739_v6, %s2631_s16  ;;  %v2190_v20 = vunpack.i.h.bf16 %v2188_v19  ;;  %v2189_v21 = vunpack.i.l.bf16 %v2188_v19 }
  0xe3   :  { %2377 = vrot.lane.b32.xlu1 %v2726_v3, %s2632_s17 }
  0xe4   :  { %v2183_v24 = vpop.permute.xlu0 %2182  ;;  %v260_v25 = vsel %vm258_vm8, %v2189_v21, %v2190_v20 }
  0xe5   :  { %v2185_v26 = vunpack.i.h.bf16 %v2183_v24  ;;  %v2184_v27 = vunpack.i.l.bf16 %v2183_v24  ;;  %v226_v28 = vpop.permute.xlu1 %225  ;;  %v1897_v29 = vpack.c.bf16 %v260_v25, %v237_v23 }
  0xe6   :  { %662 = vrot.lane.b32.xlu0 %v2710_v0, %s2631_s16  ;;  %v236_v47 = vsel %vm235_vm7, %v226_v28, %v2179_v17 }
  0xe7   :  { %2387 = vrot.lane.b32.xlu1 %v2726_v3, %s2633_s18  ;;  %1898 = vmatprep.subr.bf16.mxu0 %v1897_v29  ;;  %v239_v38 = vsel %vm235_vm7, %v2184_v27, %v2185_v26  ;;  %v238_v39 = vsel %vm235_vm7, %v2180_v14, %v2184_v27  ;;  %vm557_vm7 = vcmask 867328  }
  0xe8   :  { %v2193_v30 = vpop.permute.xlu0 %2192 }
  0xe9   :  { %v2195_v31 = vunpack.i.h.bf16 %v2193_v30  ;;  %v2194_v32 = vunpack.i.l.bf16 %v2193_v30  ;;  %v2198_v37 = vpop.permute.xlu1 %2197 }
  0xea   :  { %2382 = vrot.lane.b32.xlu0 %v2739_v6, %s2632_s17  ;;  %v2200_v40 = vunpack.i.h.bf16 %v2198_v37  ;;  %v2199_v41 = vunpack.i.l.bf16 %v2198_v37 }
  0xeb   :  { %v262_v42 = vsel %vm258_vm8, %v2194_v32, %v2195_v31  ;;  %v261_v43 = vsel %vm258_vm8, %v2190_v20, %v2194_v32  ;;  %685 = vrot.lane.b32.xlu1 %v2710_v0, %s2632_s17 }
  0xec   :  { %v249_v44 = vpop.permute.xlu0 %248  ;;  %v1977_v45 = vpack.c.bf16 %v262_v42, %v239_v38  ;;  %v1979_v46 = vpack.c.bf16 %v261_v43, %v238_v39  ;;  %v283_v53 = vsel %vm281_vm9, %v2199_v41, %v2200_v40 }
  0xed   :  { %v259_v48 = vsel %vm258_vm8, %v249_v44, %v2189_v21  ;;  %v2208_v50 = vpop.permute.xlu1 %2207  ;;  %v1092_v44 = vld [vmem:[#allocation3 + $0x8] sm:$0xff]  ;;  %vm580_vm8 = vcmask 859136  }
  0xee   :  { %v1899_v49 = vpack.c.bf16 %v259_v48, %v236_v47  ;;  %2392 = vrot.lane.b32.xlu0 %v2739_v6, %s2633_s18  ;;  %1978 = vmatprep.subr.bf16.mxu1 %v1977_v45  ;;  %v2210_v51 = vunpack.i.h.bf16 %v2208_v50  ;;  %v2209_v52 = vunpack.i.l.bf16 %v2208_v50 }
  0xef   :  { %1980 = vmatpush1.bf16.msra.mxu1 %v1979_v46  ;;  %2397 = vrot.lane.b32.xlu1 %v2726_v3, %s2634_s19 }
  0xf0   :  { %v2203_v54 = vpop.permute.xlu0 %2202  ;;  %1900 = vmatpush1.bf16.msra.mxu0 %v1899_v49  ;;  %v306_v55 = vsel %vm304_vm10, %v2209_v52, %v2210_v51  ;;  %1529 = vmatprep.mubr.f32.mxu1 %v1092_v44 }
  0xf1   :  { %v2205_v56 = vunpack.i.h.bf16 %v2203_v54  ;;  %v2204_v57 = vunpack.i.l.bf16 %v2203_v54  ;;  %v272_v58 = vpop.permute.xlu1 %271  ;;  %v1901_v59 = vpack.c.bf16 %v306_v55, %v283_v53  ;;  %1359 = vmatprep.mubr.f32.mxu0 %v1092_v44 }
  0xf2   :  { %708 = vrot.lane.b32.xlu0 %v2710_v0, %s2633_s18  ;;  %v282_v27 = vsel %vm281_vm9, %v272_v58, %v2199_v41 }
  0xf3   :  { %2407 = vrot.lane.b32.xlu1 %v2726_v3, %s2635_s20  ;;  %1902 = vmatprep.subr.bf16.mxu0 %v1901_v59  ;;  %v285_v14 = vsel %vm281_vm9, %v2204_v57, %v2205_v56  ;;  %v284_v17 = vsel %vm281_vm9, %v2200_v40, %v2204_v57  ;;  %vm603_vm9 = vcmask 850944  }
  0xf4   :  { %v2213_v60 = vpop.permute.xlu0 %2212 }
  0xf5   :  { %v2215_v61 = vunpack.i.h.bf16 %v2213_v60  ;;  %v2214_v62 = vunpack.i.l.bf16 %v2213_v60  ;;  %v2218_v12 = vpop.permute.xlu1 %2217 }
  0xf6   :  { %2402 = vrot.lane.b32.xlu0 %v2739_v6, %s2634_s19  ;;  %v2220_v19 = vunpack.i.h.bf16 %v2218_v12  ;;  %v2219_v20 = vunpack.i.l.bf16 %v2218_v12 }
  0xf7   :  { %v308_v21 = vsel %vm304_vm10, %v2214_v62, %v2215_v61  ;;  %v307_v23 = vsel %vm304_vm10, %v2210_v51, %v2214_v62  ;;  %731 = vrot.lane.b32.xlu1 %v2710_v0, %s2634_s19 }
  0xf8   :  { %v295_v24 = vpop.permute.xlu0 %294  ;;  %v1981_v25 = vpack.c.bf16 %v308_v21, %v285_v14  ;;  %v1983_v26 = vpack.c.bf16 %v307_v23, %v284_v17  ;;  %v329_v37 = vsel %vm327_vm11, %v2219_v20, %v2220_v19 }
  0xf9   :  { %v305_v28 = vsel %vm304_vm10, %v295_v24, %v2209_v52  ;;  %v2228_v30 = vpop.permute.xlu1 %2227  ;;  %vm626_vm10 = vcmask 842752  }
  0xfa   :  { %v1903_v29 = vpack.c.bf16 %v305_v28, %v282_v27  ;;  %2412 = vrot.lane.b32.xlu0 %v2739_v6, %s2635_s20  ;;  %1982 = vmatprep.subr.bf16.mxu1 %v1981_v25  ;;  %v2230_v31 = vunpack.i.h.bf16 %v2228_v30  ;;  %v2229_v32 = vunpack.i.l.bf16 %v2228_v30 }
  0xfb   :  { %1984 = vmatpush1.bf16.msra.mxu1 %v1983_v26  ;;  %2417 = vrot.lane.b32.xlu1 %v2726_v3, %s2636_s1 }
  0xfc   :  { %v2223_v38 = vpop.permute.xlu0 %2222  ;;  %1904 = vmatpush1.bf16.msra.mxu0 %v1903_v29  ;;  %v352_v39 = vsel %vm350_vm12, %v2229_v32, %v2230_v31 }
  0xfd   :  { %v2225_v40 = vunpack.i.h.bf16 %v2223_v38  ;;  %v2224_v41 = vunpack.i.l.bf16 %v2223_v38  ;;  %v318_v42 = vpop.permute.xlu1 %317  ;;  %v1905_v43 = vpack.c.bf16 %v352_v39, %v329_v37 }
  0xfe   :  { %754 = vrot.lane.b32.xlu0 %v2710_v0, %s2635_s20  ;;  %v328_v58 = vsel %vm327_vm11, %v318_v42, %v2219_v20 }
  0xff   :  { %2427 = vrot.lane.b32.xlu1 %v2726_v3, %s2637_s21  ;;  %1906 = vmatprep.subr.bf16.mxu0 %v1905_v43  ;;  %v331_v49 = vsel %vm327_vm11, %v2224_v41, %v2225_v40  ;;  %v330_v50 = vsel %vm327_vm11, %v2220_v19, %v2224_v41  ;;  %vm649_vm11 = vcmask 834560  }
 0x100   :  { %v2233_v45 = vpop.permute.xlu0 %2232 }
 0x101   :  { %v2235_v46 = vunpack.i.h.bf16 %v2233_v45  ;;  %v2234_v47 = vunpack.i.l.bf16 %v2233_v45  ;;  %v2238_v48 = vpop.permute.xlu1 %2237 }
 0x102   :  { %2422 = vrot.lane.b32.xlu0 %v2739_v6, %s2636_s1  ;;  %v2240_v51 = vunpack.i.h.bf16 %v2238_v48  ;;  %v2239_v52 = vunpack.i.l.bf16 %v2238_v48  ;;  %v964_v48 = vsel %vm963_vm1, %v2866_v22, %v2878_v34 }
 0x103   :  { %v354_v53 = vsel %vm350_vm12, %v2234_v47, %v2235_v46  ;;  %v353_v54 = vsel %vm350_vm12, %v2230_v31, %v2234_v47  ;;  %777 = vrot.lane.b32.xlu1 %v2710_v0, %s2636_s1 }
 0x104   :  { %v341_v55 = vpop.permute.xlu0 %340  ;;  %v1985_v56 = vpack.c.bf16 %v354_v53, %v331_v49  ;;  %v1987_v57 = vpack.c.bf16 %v353_v54, %v330_v50  ;;  %v375_v14 = vsel %vm373_vm13, %v2239_v52, %v2240_v51  ;;  %v2523_v50 = vld [vmem:[%s3286_s0 + $0x10] sm:$0xff] }
 0x105   :  { %v351_v59 = vsel %vm350_vm12, %v341_v55, %v2229_v32  ;;  %v2248_v61 = vpop.permute.xlu1 %2247  ;;  %vm672_vm12 = vcmask 826368  }
 0x106   :  { %v1907_v60 = vpack.c.bf16 %v351_v59, %v328_v58  ;;  %2432 = vrot.lane.b32.xlu0 %v2739_v6, %s2637_s21  ;;  %1986 = vmatprep.subr.bf16.mxu1 %v1985_v56  ;;  %v2250_v62 = vunpack.i.h.bf16 %v2248_v61  ;;  %v2249_v12 = vunpack.i.l.bf16 %v2248_v61 }
 0x107   :  { %1988 = vmatpush1.bf16.msra.mxu1 %v1987_v57  ;;  %2437 = vrot.lane.b32.xlu1 %v2726_v3, %s2638_s22  ;;  %v2525_v57 = vld [vmem:[%s3286_s0 + $0x18] sm:$0xff] }
 0x108   :  { %v2243_v17 = vpop.permute.xlu0 %2242  ;;  %1908 = vmatpush1.bf16.msra.mxu0 %v1907_v60  ;;  %v398_v19 = vsel %vm396_vm14, %v2249_v12, %v2250_v62  ;;  %v974_v60 = vmax.f32 %v2763_v13, %v964_v48  ;;  %v989_v13 = vsel %vm74_vm0, %v2907_v1, %v2905_v63 }
 0x109   :  { %v2245_v20 = vunpack.i.h.bf16 %v2243_v17  ;;  %v2244_v21 = vunpack.i.l.bf16 %v2243_v17  ;;  %v364_v23 = vpop.permute.xlu1 %363  ;;  %v1909_v24 = vpack.c.bf16 %v398_v19, %v375_v14 }
 0x10a   :  { %800 = vrot.lane.b32.xlu0 %v2710_v0, %s2637_s21  ;;  %v374_v42 = vsel %vm373_vm13, %v364_v23, %v2239_v52  ;;  %v965_v52 = vsel %vm963_vm1, %v2878_v34, %v2876_v33  ;;  %v2526_v34 = vld [vmem:[%s3286_s0 + $0x20] sm:$0xff] }
 0x10b   :  { %2447 = vrot.lane.b32.xlu1 %v2726_v3, %s2639_s23  ;;  %1910 = vmatprep.subr.bf16.mxu0 %v1909_v24  ;;  %v377_v29 = vsel %vm373_vm13, %v2244_v21, %v2245_v20  ;;  %v376_v30 = vsel %vm373_vm13, %v2240_v51, %v2244_v21  ;;  %v3035_v58 = vpack.i.bf16 %v2526_v34, %v2525_v57  ;;  %vm695_vm13 = vcmask 818176  }
 0x10c   :  { %v2253_v25 = vpop.permute.xlu0 %2252  ;;  %v975_v61 = vmax.f32 %v2759_v11, %v965_v52  ;;  %v990_v11 = vsel %vm74_vm0, %v2905_v63, %v2913_v4 }
 0x10d   :  { %v2255_v26 = vunpack.i.h.bf16 %v2253_v25  ;;  %v2254_v27 = vunpack.i.l.bf16 %v2253_v25  ;;  %v2991_v28 = vpop.permute.xlu1 %2257 }
 0x10e   :  { %2442 = vrot.lane.b32.xlu0 %v2739_v6, %s2638_s22  ;;  %v2260_v31 = vunpack.i.h.bf16 %v2991_v28  ;;  %v2259_v32 = vunpack.i.l.bf16 %v2991_v28 }
 0x10f   :  { %v400_v37 = vsel %vm396_vm14, %v2254_v27, %v2255_v26  ;;  %v399_v38 = vsel %vm396_vm14, %v2250_v62, %v2254_v27  ;;  %823 = vrot.lane.b32.xlu1 %v2710_v0, %s2638_s22  ;;  %v966_v62 = vsel %vm963_vm1, %v2876_v33, %v2884_v36  ;;  %v998_v26 = vmax.f32 %v974_v60, %v989_v13 }
 0x110   :  { %v387_v39 = vpop.permute.xlu0 %386  ;;  %v1989_v40 = vpack.c.bf16 %v400_v37, %v377_v29  ;;  %v1991_v41 = vpack.c.bf16 %v399_v38, %v376_v30  ;;  %v421_v0 = vsel %vm419_vm15, %v2259_v32, %v2260_v31  ;;  %v999_v27 = vmax.f32 %v975_v61, %v990_v11 }
 0x111   :  { %v397_v43 = vsel %vm396_vm14, %v387_v39, %v2249_v12  ;;  %v2268_v45 = vpop.permute.xlu1 %2267  ;;  %v967_v12 = vsel %vm963_vm1, %v2884_v36, %v2882_v35  ;;  %v1019_v35 = vsel %vm1018_vm3, %v2917_v5, %v2925_v10  ;;  %v1020_v36 = vsel %vm1018_vm3, %v2925_v10, %v2923_v9 }
 0x112   :  { %v1911_v44 = vpack.c.bf16 %v397_v43, %v374_v42  ;;  %2452 = vrot.lane.b32.xlu0 %v2739_v6, %s2639_s23  ;;  %1990 = vmatprep.subr.bf16.mxu1 %v1989_v40  ;;  %v2270_v46 = vunpack.i.h.bf16 %v2268_v45  ;;  %v2269_v47 = vunpack.i.l.bf16 %v2268_v45  ;;  %v2522_v6 = vld [vmem:[%s3286_s0 + $0x8] sm:$0xff]  ;;  %v976_v37 = vmax.f32 %v2770_v16, %v966_v62 }
 0x113   :  { %1992 = vmatpush1.bf16.msra.mxu1 %v1991_v41  ;;  %2457 = vrot.lane.b32.xlu1 %v2726_v3, %s2640_s24  ;;  %v2466_v51 = vpack.i.bf16 %v2523_v50, %v2522_v6  ;;  %v3025_v3 = vld [vmem:[%s3286_s0] sm:$0xff]  ;;  %v1028_v40 = vmul.f32 %v1019_v35, %v998_v26  ;;  %v1029_v41 = vmul.f32 %v1020_v36, %v999_v27  ;;  %s2642_s0 = smov 90   ;;  %vm718_vm14 = vcmask 809984  }
 0x114   :  { %v2263_v49 = vpop.permute.xlu0 %2262  ;;  %1912 = vmatpush1.bf16.msra.mxu0 %v1911_v44  ;;  %v444_v53 = vsel %vm442_vm2, %v2269_v47, %v2270_v46  ;;  %v977_v16 = vmax.f32 %v2766_v15, %v967_v12  ;;  %vm764_vm1 = vcmask 793600  }
 0x115   :  { %v2265_v54 = vunpack.i.h.bf16 %v2263_v49  ;;  %v2264_v55 = vunpack.i.l.bf16 %v2263_v49  ;;  %v410_v56 = vpop.permute.xlu1 %409  ;;  %v1913_v59 = vpack.c.bf16 %v444_v53, %v421_v0  ;;  %v2486_v0 = vpack.i.bf16 %v1029_v41, %v1028_v40 }
 0x116   :  { %846 = vrot.lane.b32.xlu0 %v3025_v3, %s2639_s23  ;;  %v420_v38 = vsel %vm419_vm15, %v410_v56, %v2259_v32  ;;  %v1001_v32 = vmax.f32 %v977_v16, %v2911_v2 }
 0x117   :  { %2467 = vrot.lane.b32.xlu1 %v2466_v51, %s2641_s10  ;;  %1914 = vmatprep.subr.bf16.mxu0 %v1913_v59  ;;  %v423_v20 = vsel %vm419_vm15, %v2264_v55, %v2265_v54  ;;  %v422_v21 = vsel %vm419_vm15, %v2260_v31, %v2264_v55  ;;  %v991_v31 = vsel %vm74_vm0, %v2913_v4, %v2911_v2  ;;  %vm741_vm15 = vcmask 801792  }
 0x118   :  { %v2273_v14 = vpop.permute.xlu0 %2272  ;;  %v988_v2 = vsel %vm74_vm0, %v2919_v7, %v2907_v1  ;;  %v973_v55 = vmax.f32 %v2754_v8, %v2866_v22  ;;  %vm534_vm0 = vcmask 875520  }
 0x119   :  { %v2275_v17 = vunpack.i.h.bf16 %v2273_v14  ;;  %v2274_v33 = vunpack.i.l.bf16 %v2273_v14  ;;  %v3060_v19 = vpop.permute.xlu1 %2277 }
 0x11a   :  { %2462 = vrot.lane.b32.xlu0 %v3035_v58, %s2640_s24  ;;  %v2280_v63 = vunpack.i.h.bf16 %v3060_v19  ;;  %v2279_v23 = vunpack.i.l.bf16 %v3060_v19  ;;  %v997_v7 = vmax.f32 %v973_v55, %v988_v2 }
 0x11b   :  { %v446_v24 = vsel %vm442_vm2, %v2274_v33, %v2275_v17  ;;  %v445_v25 = vsel %vm442_vm2, %v2270_v46, %v2274_v33  ;;  %869 = vrot.lane.b32.xlu1 %v3025_v3, %s2640_s24  ;;  %v1000_v46 = vmax.f32 %v976_v37, %v991_v31 }
 0x11c   :  { %v433_v10 = vpop.permute.xlu0 %432  ;;  %v1993_v29 = vpack.c.bf16 %v446_v24, %v423_v20  ;;  %v1995_v30 = vpack.c.bf16 %v445_v25, %v422_v21  ;;  %v467_v4 = vsel %vm465_vm4, %v2279_v23, %v2280_v63 }
 0x11d   :  { %v443_v39 = vsel %vm442_vm2, %v433_v10, %v2269_v47  ;;  %v2288_v43 = vpop.permute.xlu1 %2287  ;;  %v1021_v47 = vsel %vm1018_vm3, %v2923_v9, %v2929_v18  ;;  %vm787_vm2 = vcmask 785408   ;;  %vm810_vm3 = vcmask 777216  }
 0x11e   :  { %v1915_v42 = vpack.c.bf16 %v443_v39, %v420_v38  ;;  %2472 = vrot.lane.b32.xlu0 %v3035_v58, %s2641_s10  ;;  %1994 = vmatprep.subr.bf16.mxu1 %v1993_v29  ;;  %v2290_v44 = vunpack.i.h.bf16 %v2288_v43  ;;  %v2289_v45 = vunpack.i.l.bf16 %v2288_v43  ;;  %v1030_v52 = vmul.f32 %v1021_v47, %v1000_v46 }
 0x11f   :  { %1996 = vmatpush1.bf16.msra.mxu1 %v1995_v30  ;;  %2477 = vrot.lane.b32.xlu1 %v2466_v51, %s2642_s0  ;;  %v1031_v51 = vmul.f32 %v2929_v18, %v1001_v32 }
 0x120   :  { %v2283_v28 = vpop.permute.xlu0 %2282  ;;  %1916 = vmatpush1.bf16.msra.mxu0 %v1915_v42  ;;  %v490_v15 = vsel %vm488_vm5, %v2289_v45, %v2290_v44 }
 0x121   :  { %v2285_v48 = vunpack.i.h.bf16 %v2283_v28  ;;  %v2284_v49 = vunpack.i.l.bf16 %v2283_v28  ;;  %v456_v6 = vpop.permute.xlu1 %455  ;;  %v1917_v50 = vpack.c.bf16 %v490_v15, %v467_v4  ;;  %v2491_v61 = vpack.i.bf16 %v1031_v51, %v1030_v52 }
 0x122   :  { %892 = vrot.lane.b32.xlu0 %v3025_v3, %s2641_s10 }
 0x123   :  { %2487 = vrot.lane.b32.xlu1 %v2486_v0, %s2623_s8  ;;  %1918 = vmatprep.subr.bf16.mxu0 %v1917_v50  ;;  %v469_v57 = vsel %vm465_vm4, %v2284_v49, %v2285_v48  ;;  %v468_v18 = vsel %vm465_vm4, %v2280_v63, %v2284_v49 }
 0x124   :  { %v2293_v53 = vpop.permute.xlu0 %2292 }
 0x125   :  { %v2295_v9 = vunpack.i.h.bf16 %v2293_v53  ;;  %v2294_v54 = vunpack.i.l.bf16 %v2293_v53  ;;  %v2298_v56 = vpop.permute.xlu1 %2297 }
 0x126   :  { %2482 = vrot.lane.b32.xlu0 %v3035_v58, %s2642_s0  ;;  %v2300_v34 = vunpack.i.h.bf16 %v2298_v56  ;;  %v2299_v59 = vunpack.i.l.bf16 %v2298_v56  ;;  %v466_v58 = vsel %vm465_vm4, %v456_v6, %v2279_v23  ;;  %vm833_vm4 = vcmask 769024  }
 0x127   :  { %v492_v60 = vsel %vm488_vm5, %v2294_v54, %v2295_v9  ;;  %v491_v1 = vsel %vm488_vm5, %v2290_v44, %v2294_v54  ;;  %915 = vrot.lane.b32.xlu1 %v3025_v3, %s2642_s0  ;;  %v1027_v3 = vmul.f32 %v2917_v5, %v997_v7 }
 0x128   :  { %v479_v62 = vpop.permute.xlu0 %478  ;;  %v1997_v8 = vpack.c.bf16 %v492_v60, %v469_v57  ;;  %v1999_v22 = vpack.c.bf16 %v491_v1, %v468_v18  ;;  %v513_v33 = vsel %vm511_vm6, %v2299_v59, %v2300_v34 }
 0x129   :  { %v489_v12 = vsel %vm488_vm5, %v479_v62, %v2289_v45  ;;  %v2308_v13 = vpop.permute.xlu1 %2307 }
 0x12a   :  { %v1919_v14 = vpack.c.bf16 %v489_v12, %v466_v58  ;;  %2492 = vrot.lane.b32.xlu0 %v2491_v61, %s2623_s8  ;;  %1998 = vmatprep.subr.bf16.mxu1 %v1997_v8  ;;  %v2310_v11 = vunpack.i.h.bf16 %v2308_v13  ;;  %v2309_v17 = vunpack.i.l.bf16 %v2308_v13 }
 0x12b   :  { %2000 = vmatpush1.bf16.msra.mxu1 %v1999_v22 }
 0x12c   :  { %v2303_v35 = vpop.permute.xlu0 %2302  ;;  %1920 = vmatpush1.bf16.msra.mxu0 %v1919_v14  ;;  %v536_v36 = vsel %vm534_vm0, %v2309_v17, %v2310_v11 }
 0x12d   :  { %v2305_v19 = vunpack.i.h.bf16 %v2303_v35  ;;  %v2304_v20 = vunpack.i.l.bf16 %v2303_v35  ;;  %v502_v21 = vpop.permute.xlu1 %501  ;;  %v1921_v63 = vpack.c.bf16 %v536_v36, %v513_v33 }
 0x12e   :  { %1037 = vrot.lane.b32.xlu0 %v1027_v3, %s2623_s8  ;;  %v512_v40 = vsel %vm511_vm6, %v502_v21, %v2299_v59 }
 0x12f   :  { %1922 = vmatprep.subr.bf16.mxu0 %v1921_v63  ;;  %v515_v27 = vsel %vm511_vm6, %v2304_v20, %v2305_v19  ;;  %v514_v10 = vsel %vm511_vm6, %v2300_v34, %v2304_v20  ;;  %vm856_vm6 = vcmask 760832  }
 0x130   :  { %v2313_v23 = vpop.permute.xlu0 %2312 }
 0x131   :  { %v2315_v24 = vunpack.i.h.bf16 %v2313_v23  ;;  %v2314_v25 = vunpack.i.l.bf16 %v2313_v23  ;;  %v2318_v26 = vpop.permute.xlu1 %2317 }
 0x132   :  { %v2320_v5 = vunpack.i.h.bf16 %v2318_v26  ;;  %v2319_v29 = vunpack.i.l.bf16 %v2318_v26 }
 0x133   :  { %v538_v30 = vsel %vm534_vm0, %v2314_v25, %v2315_v24  ;;  %v537_v37 = vsel %vm534_vm0, %v2310_v11, %v2314_v25 }
 0x134   :  { %v525_v31 = vpop.permute.xlu0 %524  ;;  %v2001_v38 = vpack.c.bf16 %v538_v30, %v515_v27  ;;  %v2003_v39 = vpack.c.bf16 %v537_v37, %v514_v10  ;;  %v559_v45 = vsel %vm557_vm7, %v2319_v29, %v2320_v5 }
 0x135   :  { %v535_v41 = vsel %vm534_vm0, %v525_v31, %v2309_v17  ;;  %v2328_v43 = vpop.permute.xlu1 %2327  ;;  %vm879_vm0 = vcmask 752640  }
 0x136   :  { %v1923_v42 = vpack.c.bf16 %v535_v41, %v512_v40  ;;  %2002 = vmatprep.subr.bf16.mxu1 %v2001_v38  ;;  %v2330_v16 = vunpack.i.h.bf16 %v2328_v43  ;;  %v2329_v44 = vunpack.i.l.bf16 %v2328_v43 }
 0x137   :  { %2004 = vmatpush1.bf16.msra.mxu1 %v2003_v39 }
 0x138   :  { %v2323_v4 = vpop.permute.xlu0 %2322  ;;  %1924 = vmatpush1.bf16.msra.mxu0 %v1923_v42  ;;  %v582_v28 = vsel %vm580_vm8, %v2329_v44, %v2330_v16 }
 0x139   :  { %v2325_v32 = vunpack.i.h.bf16 %v2323_v4  ;;  %v2324_v46 = vunpack.i.l.bf16 %v2323_v4  ;;  %v548_v47 = vpop.permute.xlu1 %547  ;;  %v1925_v15 = vpack.c.bf16 %v582_v28, %v559_v45 }
 0x13a   :  { %v558_v57 = vsel %vm557_vm7, %v548_v47, %v2319_v29 }
 0x13b   :  { %1926 = vmatprep.subr.bf16.mxu0 %v1925_v15  ;;  %v561_v50 = vsel %vm557_vm7, %v2324_v46, %v2325_v32  ;;  %v560_v52 = vsel %vm557_vm7, %v2320_v5, %v2324_v46  ;;  %vm902_vm7 = vcmask 744448  }
 0x13c   :  { %v2333_v0 = vpop.permute.xlu0 %2332 }
 0x13d   :  { %v2335_v48 = vunpack.i.h.bf16 %v2333_v0  ;;  %v2334_v49 = vunpack.i.l.bf16 %v2333_v0  ;;  %v2338_v6 = vpop.permute.xlu1 %2337 }
 0x13e   :  { %v2340_v51 = vunpack.i.h.bf16 %v2338_v6  ;;  %v2339_v53 = vunpack.i.l.bf16 %v2338_v6 }
 0x13f   :  { %v584_v2 = vsel %vm580_vm8, %v2334_v49, %v2335_v48  ;;  %v583_v9 = vsel %vm580_vm8, %v2330_v16, %v2334_v49 }
 0x140   :  { %v571_v54 = vpop.permute.xlu0 %570  ;;  %v2005_v55 = vpack.c.bf16 %v584_v2, %v561_v50  ;;  %v2007_v56 = vpack.c.bf16 %v583_v9, %v560_v52  ;;  %v605_v7 = vsel %vm603_vm9, %v2339_v53, %v2340_v51 }
 0x141   :  { %v581_v18 = vsel %vm580_vm8, %v571_v54, %v2329_v44  ;;  %v2348_v59 = vpop.permute.xlu1 %2347  ;;  %vm925_vm8 = vcmask 736256  }
 0x142   :  { %v1927_v34 = vpack.c.bf16 %v581_v18, %v558_v57  ;;  %2006 = vmatprep.subr.bf16.mxu1 %v2005_v55  ;;  %v2350_v60 = vunpack.i.h.bf16 %v2348_v59  ;;  %v2349_v1 = vunpack.i.l.bf16 %v2348_v59 }
 0x143   :  { %2008 = vmatpush1.bf16.msra.mxu1 %v2007_v56 }
 0x144   :  { %v2343_v61 = vpop.permute.xlu0 %2342  ;;  %1928 = vmatpush1.bf16.msra.mxu0 %v1927_v34  ;;  %v628_v62 = vsel %vm626_vm10, %v2349_v1, %v2350_v60 }
 0x145   :  { %v2345_v8 = vunpack.i.h.bf16 %v2343_v61  ;;  %v2344_v22 = vunpack.i.l.bf16 %v2343_v61  ;;  %v594_v58 = vpop.permute.xlu1 %593  ;;  %v1929_v12 = vpack.c.bf16 %v628_v62, %v605_v7 }
 0x146   :  { %v604_v24 = vsel %vm603_vm9, %v594_v58, %v2339_v53 }
 0x147   :  { %1930 = vmatprep.subr.bf16.mxu0 %v1929_v12  ;;  %v607_v33 = vsel %vm603_vm9, %v2344_v22, %v2345_v8  ;;  %v606_v3 = vsel %vm603_vm9, %v2340_v51, %v2344_v22 }
 0x148   :  { %v2353_v14 = vpop.permute.xlu0 %2352 }
 0x149   :  { %v2355_v13 = vunpack.i.h.bf16 %v2353_v14  ;;  %v2354_v11 = vunpack.i.l.bf16 %v2353_v14  ;;  %v2358_v17 = vpop.permute.xlu1 %2357 }
 0x14a   :  { %v2360_v35 = vunpack.i.h.bf16 %v2358_v17  ;;  %v2359_v36 = vunpack.i.l.bf16 %v2358_v17 }
 0x14b   :  { %v630_v19 = vsel %vm626_vm10, %v2354_v11, %v2355_v13  ;;  %v629_v20 = vsel %vm626_vm10, %v2350_v60, %v2354_v11 }
 0x14c   :  { %v617_v21 = vpop.permute.xlu0 %616  ;;  %v2009_v63 = vpack.c.bf16 %v630_v19, %v607_v33  ;;  %v2011_v23 = vpack.c.bf16 %v629_v20, %v606_v3  ;;  %v651_v29 = vsel %vm649_vm11, %v2359_v36, %v2360_v35 }
 0x14d   :  { %v627_v25 = vsel %vm626_vm10, %v617_v21, %v2349_v1  ;;  %v2368_v27 = vpop.permute.xlu1 %2367 }
 0x14e   :  { %v1931_v26 = vpack.c.bf16 %v627_v25, %v604_v24  ;;  %2010 = vmatprep.subr.bf16.mxu1 %v2009_v63  ;;  %v2370_v10 = vunpack.i.h.bf16 %v2368_v27  ;;  %v2369_v5 = vunpack.i.l.bf16 %v2368_v27 }
 0x14f   :  { %2012 = vmatpush1.bf16.msra.mxu1 %v2011_v23 }
 0x150   :  { %v2363_v30 = vpop.permute.xlu0 %2362  ;;  %1932 = vmatpush1.bf16.msra.mxu0 %v1931_v26  ;;  %v674_v37 = vsel %vm672_vm12, %v2369_v5, %v2370_v10 }
 0x151   :  { %v2365_v31 = vunpack.i.h.bf16 %v2363_v30  ;;  %v2364_v38 = vunpack.i.l.bf16 %v2363_v30  ;;  %v640_v39 = vpop.permute.xlu1 %639  ;;  %v1933_v40 = vpack.c.bf16 %v674_v37, %v651_v29 }
 0x152   :  { %v650_v48 = vsel %vm649_vm11, %v640_v39, %v2359_v36 }
 0x153   :  { %1934 = vmatprep.subr.bf16.mxu0 %v1933_v40  ;;  %v653_v44 = vsel %vm649_vm11, %v2364_v38, %v2365_v31  ;;  %v652_v45 = vsel %vm649_vm11, %v2360_v35, %v2364_v38 }
 0x154   :  { %v2373_v41 = vpop.permute.xlu0 %2372 }
 0x155   :  { %v2375_v42 = vunpack.i.h.bf16 %v2373_v41  ;;  %v2374_v43 = vunpack.i.l.bf16 %v2373_v41  ;;  %v2378_v16 = vpop.permute.xlu1 %2377 }
 0x156   :  { %v2380_v4 = vunpack.i.h.bf16 %v2378_v16  ;;  %v2379_v28 = vunpack.i.l.bf16 %v2378_v16 }
 0x157   :  { %v676_v32 = vsel %vm672_vm12, %v2374_v43, %v2375_v42  ;;  %v675_v46 = vsel %vm672_vm12, %v2370_v10, %v2374_v43 }
 0x158   :  { %v663_v47 = vpop.permute.xlu0 %662  ;;  %v2013_v15 = vpack.c.bf16 %v676_v32, %v653_v44  ;;  %v2015_v0 = vpack.c.bf16 %v675_v46, %v652_v45  ;;  %v697_v53 = vsel %vm695_vm13, %v2379_v28, %v2380_v4  ;;  %v1091_v32 = vld [vmem:[#allocation3] sm:$0xff] }
 0x159   :  { %v673_v49 = vsel %vm672_vm12, %v663_v47, %v2369_v5  ;;  %v2388_v50 = vpop.permute.xlu1 %2387  ;;  %v1095_v47 = vld [vmem:[#allocation3 + $0x20] sm:$0xff] }
 0x15a   :  { %v1935_v6 = vpack.c.bf16 %v673_v49, %v650_v48  ;;  %2014 = vmatprep.subr.bf16.mxu1 %v2013_v15  ;;  %v2390_v52 = vunpack.i.h.bf16 %v2388_v50  ;;  %v2389_v51 = vunpack.i.l.bf16 %v2388_v50  ;;  %v1094_v50 = vld [vmem:[#allocation3 + $0x18] sm:$0xff] }
 0x15b   :  { %2016 = vmatpush1.bf16.msra.mxu1 %v2015_v0 }
 0x15c   :  { %v2383_v2 = vpop.permute.xlu0 %2382  ;;  %1936 = vmatpush1.bf16.msra.mxu0 %v1935_v6  ;;  %v720_v9 = vsel %vm718_vm14, %v2389_v51, %v2390_v52 }
 0x15d   :  { %v2385_v54 = vunpack.i.h.bf16 %v2383_v2  ;;  %v2384_v55 = vunpack.i.l.bf16 %v2383_v2  ;;  %v686_v56 = vpop.permute.xlu1 %685  ;;  %v1937_v57 = vpack.c.bf16 %v720_v9, %v697_v53 }
 0x15e   :  { %v696_v13 = vsel %vm695_vm13, %v686_v56, %v2379_v28 }
 0x15f   :  { %1938 = vmatprep.subr.bf16.mxu0 %v1937_v57  ;;  %v699_v1 = vsel %vm695_vm13, %v2384_v55, %v2385_v54  ;;  %v698_v7 = vsel %vm695_vm13, %v2380_v4, %v2384_v55 }
 0x160   :  { %v2393_v18 = vpop.permute.xlu0 %2392 }
 0x161   :  { %v2395_v34 = vunpack.i.h.bf16 %v2393_v18  ;;  %v2394_v59 = vunpack.i.l.bf16 %v2393_v18  ;;  %v2398_v60 = vpop.permute.xlu1 %2397 }
 0x162   :  { %v2400_v61 = vunpack.i.h.bf16 %v2398_v60  ;;  %v2399_v62 = vunpack.i.l.bf16 %v2398_v60 }
 0x163   :  { %v722_v8 = vsel %vm718_vm14, %v2394_v59, %v2395_v34  ;;  %v721_v22 = vsel %vm718_vm14, %v2390_v52, %v2394_v59  ;;  %v1097_v59 = vld [vmem:[#allocation3 + $0x30] sm:$0xff] }
 0x164   :  { %v709_v58 = vpop.permute.xlu0 %708  ;;  %v2017_v12 = vpack.c.bf16 %v722_v8, %v699_v1  ;;  %v2019_v14 = vpack.c.bf16 %v721_v22, %v698_v7  ;;  %v743_v36 = vsel %vm741_vm15, %v2399_v62, %v2400_v61  ;;  %v1101_v8 = vld [vmem:[#allocation3 + $0x50] sm:$0xff] }
 0x165   :  { %v719_v11 = vsel %vm718_vm14, %v709_v58, %v2389_v51  ;;  %v2408_v33 = vpop.permute.xlu1 %2407  ;;  %v1098_v51 = vld [vmem:[#allocation3 + $0x38] sm:$0xff] }
 0x166   :  { %v1939_v17 = vpack.c.bf16 %v719_v11, %v696_v13  ;;  %2018 = vmatprep.subr.bf16.mxu1 %v2017_v12  ;;  %v2410_v3 = vunpack.i.h.bf16 %v2408_v33  ;;  %v2409_v35 = vunpack.i.l.bf16 %v2408_v33  ;;  %v1100_v11 = vld [vmem:[#allocation3 + $0x48] sm:$0xff] }
 0x167   :  { %2020 = vmatpush1.bf16.msra.mxu1 %v2019_v14 }
 0x168   :  { %v2403_v19 = vpop.permute.xlu0 %2402  ;;  %1940 = vmatpush1.bf16.msra.mxu0 %v1939_v17  ;;  %v766_v20 = vsel %vm764_vm1, %v2409_v35, %v2410_v3 }
 0x169   :  { %v2405_v21 = vunpack.i.h.bf16 %v2403_v19  ;;  %v2404_v63 = vunpack.i.l.bf16 %v2403_v19  ;;  %v732_v23 = vpop.permute.xlu1 %731  ;;  %v1941_v24 = vpack.c.bf16 %v766_v20, %v743_v36  ;;  %v2643_v20 = vmov 0.0  }
 0x16a   :  { %v742_v42 = vsel %vm741_vm15, %v732_v23, %v2399_v62 }
 0x16b   :  { %1942 = vmatprep.subr.bf16.mxu0 %v1941_v24  ;;  %v745_v5 = vsel %vm741_vm15, %v2404_v63, %v2405_v21  ;;  %v744_v29 = vsel %vm741_vm15, %v2400_v61, %v2404_v63 }
 0x16c   :  { %v2413_v25 = vpop.permute.xlu0 %2412 }
 0x16d   :  { %v2415_v26 = vunpack.i.h.bf16 %v2413_v25  ;;  %v2414_v27 = vunpack.i.l.bf16 %v2413_v25  ;;  %v2418_v10 = vpop.permute.xlu1 %2417 }
 0x16e   :  { %v2420_v30 = vunpack.i.h.bf16 %v2418_v10  ;;  %v2419_v37 = vunpack.i.l.bf16 %v2418_v10 }
 0x16f   :  { %v768_v31 = vsel %vm764_vm1, %v2414_v27, %v2415_v26  ;;  %v767_v38 = vsel %vm764_vm1, %v2410_v3, %v2414_v27 }
 0x170   :  { %v755_v39 = vpop.permute.xlu0 %754  ;;  %v2021_v40 = vpack.c.bf16 %v768_v31, %v745_v5  ;;  %v2023_v41 = vpack.c.bf16 %v767_v38, %v744_v29  ;;  %v789_v28 = vsel %vm787_vm2, %v2419_v37, %v2420_v30 }
 0x171   :  { %v765_v43 = vsel %vm764_vm1, %v755_v39, %v2409_v35  ;;  %v2428_v44 = vpop.permute.xlu1 %2427 }
 0x172   :  { %v1943_v16 = vpack.c.bf16 %v765_v43, %v742_v42  ;;  %2022 = vmatprep.subr.bf16.mxu1 %v2021_v40  ;;  %v2430_v45 = vunpack.i.h.bf16 %v2428_v44  ;;  %v2429_v4 = vunpack.i.l.bf16 %v2428_v44 }
 0x173   :  { %2024 = vmatpush1.bf16.msra.mxu1 %v2023_v41 }
 0x174   :  { %v2423_v46 = vpop.permute.xlu0 %2422  ;;  %1944 = vmatpush1.bf16.msra.mxu0 %v1943_v16  ;;  %v812_v15 = vsel %vm810_vm3, %v2429_v4, %v2430_v45 }
 0x175   :  { %v2425_v0 = vunpack.i.h.bf16 %v2423_v46  ;;  %v2424_v48 = vunpack.i.l.bf16 %v2423_v46  ;;  %v778_v49 = vpop.permute.xlu1 %777  ;;  %v1945_v6 = vpack.c.bf16 %v812_v15, %v789_v28 }
 0x176   :  { %1530 = vmatmul.mubr.f32.vlgmr.msra.gmra.mrb[0].mxu1 %v1091_v32  ;;  %v788_v61 = vsel %vm787_vm2, %v778_v49, %v2419_v37 }
 0x177   :  { %1360 = vmatmul.mubr.f32.vlgmr.msra.gmra.mrb[0].mxu0 %v1091_v32  ;;  %1534 = vmatprep.mubr.f32.mxu1 %v1095_v47  ;;  %v791_v54 = vsel %vm787_vm2, %v2424_v48, %v2425_v0  ;;  %v790_v55 = vsel %vm787_vm2, %v2420_v30, %v2424_v48 }
 0x178   :  { %v2433_v52 = vpop.permute.xlu0 %2432  ;;  %1946 = vmatprep.subr.bf16.mxu0 %v1945_v6  ;;  %1364 = vmatprep.mubr.f32.mxu0 %v1095_v47 }
 0x179   :  { %v2435_v53 = vunpack.i.h.bf16 %v2433_v52  ;;  %v2434_v2 = vunpack.i.l.bf16 %v2433_v52  ;;  %v2438_v9 = vpop.permute.xlu1 %2437 }
 0x17a   :  { %1535 = vmatmul.mubr.f32.gmra.mrb[2].mxu1 %v1094_v50  ;;  %v2440_v57 = vunpack.i.h.bf16 %v2438_v9  ;;  %v2439_v18 = vunpack.i.l.bf16 %v2438_v9 }
 0x17b   :  { %v813_v56 = vsel %vm810_vm3, %v2430_v45, %v2434_v2  ;;  %v814_v34 = vsel %vm810_vm3, %v2434_v2, %v2435_v53  ;;  %1365 = vmatmul.mubr.f32.gmra.mrb[2].mxu0 %v1094_v50  ;;  %1539 = vmatprep.mubr.f32.mxu1 %v1098_v51 }
 0x17c   :  { %v801_v60 = vpop.permute.xlu0 %800  ;;  %v2025_v1 = vpack.c.bf16 %v814_v34, %v791_v54  ;;  %v2027_v7 = vpack.c.bf16 %v813_v56, %v790_v55  ;;  %1369 = vmatprep.mubr.f32.mxu0 %v1098_v51  ;;  %v835_v13 = vsel %vm833_vm4, %v2439_v18, %v2440_v57 }
 0x17d   :  { %v811_v62 = vsel %vm810_vm3, %v801_v60, %v2429_v4  ;;  %v2448_v58 = vpop.permute.xlu1 %2447 }
 0x17e   :  { %v1947_v22 = vpack.c.bf16 %v811_v62, %v788_v61  ;;  %2026 = vmatprep.subr.bf16.mxu1 %v2025_v1  ;;  %1540 = vmatmul.mubr.f32.gmra.mrb[4].mxu1 %v1097_v59  ;;  %v2450_v12 = vunpack.i.h.bf16 %v2448_v58  ;;  %v2449_v14 = vunpack.i.l.bf16 %v2448_v58 }
 0x17f   :  { %2028 = vmatpush1.bf16.msra.mxu1 %v2027_v7  ;;  %1370 = vmatmul.mubr.f32.gmra.mrb[4].mxu0 %v1097_v59 }
 0x180   :  { %v2443_v17 = vpop.permute.xlu0 %2442  ;;  %1948 = vmatpush1.bf16.msra.mxu0 %v1947_v22  ;;  %1544 = vmatprep.mubr.f32.mxu1 %v1101_v8  ;;  %v858_v33 = vsel %vm856_vm6, %v2449_v14, %v2450_v12 }
 0x181   :  { %1374 = vmatprep.mubr.f32.mxu0 %v1101_v8  ;;  %v2445_v3 = vunpack.i.h.bf16 %v2443_v17  ;;  %v2444_v35 = vunpack.i.l.bf16 %v2443_v17  ;;  %v824_v36 = vpop.permute.xlu1 %823  ;;  %v1949_v19 = vpack.c.bf16 %v858_v33, %v835_v13 }
 0x182   :  { %1545 = vmatmul.mubr.f32.gmra.mrb[6].mxu1 %v1100_v11  ;;  %v834_v38 = vsel %vm833_vm4, %v824_v36, %v2439_v18 }
 0x183   :  { %1375 = vmatmul.mubr.f32.gmra.mrb[6].mxu0 %v1100_v11  ;;  %1614 = vmatprep.mubr.f32.mxu1 %v2643_v20  ;;  %v837_v25 = vsel %vm833_vm4, %v2444_v35, %v2445_v3  ;;  %v836_v26 = vsel %vm833_vm4, %v2440_v57, %v2444_v35 }
 0x184   :  { %v2453_v21 = vpop.permute.xlu0 %2452  ;;  %1950 = vmatprep.subr.bf16.mxu0 %v1949_v19  ;;  %1444 = vmatprep.mubr.f32.mxu0 %v2643_v20 }
 0x185   :  { %v2455_v63 = vunpack.i.h.bf16 %v2453_v21  ;;  %v2454_v23 = vunpack.i.l.bf16 %v2453_v21  ;;  %v2458_v24 = vpop.permute.xlu1 %2457 }
 0x186   :  { %v2460_v10 = vunpack.i.h.bf16 %v2458_v24  ;;  %v2459_v5 = vunpack.i.l.bf16 %v2458_v24  ;;  %v1096_v24 = vld [vmem:[#allocation3 + $0x28] sm:$0xff] }
 0x187   :  { %v859_v27 = vsel %vm856_vm6, %v2450_v12, %v2454_v23  ;;  %v860_v29 = vsel %vm856_vm6, %v2454_v23, %v2455_v63  ;;  %v1093_v23 = vld [vmem:[#allocation3 + $0x10] sm:$0xff] }
 0x188   :  { %v847_v30 = vpop.permute.xlu0 %846  ;;  %v2029_v37 = vpack.c.bf16 %v860_v29, %v837_v25  ;;  %v2031_v31 = vpack.c.bf16 %v859_v27, %v836_v26  ;;  %v881_v16 = vsel %vm879_vm0, %v2459_v5, %v2460_v10  ;;  %v1099_v25 = vld [vmem:[#allocation3 + $0x40] sm:$0xff]  ;;  %v1102_v26 = vld [vmem:[#allocation3 + $0x58] sm:$0xff] }
 0x189   :  { %v857_v39 = vsel %vm856_vm6, %v847_v30, %v2449_v14  ;;  %v2468_v41 = vpop.permute.xlu1 %2467 }
 0x18a   :  { %v1951_v40 = vpack.c.bf16 %v857_v39, %v834_v38  ;;  %2030 = vmatprep.subr.bf16.mxu1 %v2029_v37  ;;  %v2470_v42 = vunpack.i.h.bf16 %v2468_v41  ;;  %v2469_v43 = vunpack.i.l.bf16 %v2468_v41 }
 0x18b   :  { %2032 = vmatpush1.bf16.msra.mxu1 %v2031_v31 }
 0x18c   :  { %v2463_v44 = vpop.permute.xlu0 %2462  ;;  %1952 = vmatpush1.bf16.msra.mxu0 %v1951_v40  ;;  %v904_v45 = vsel %vm902_vm7, %v2469_v43, %v2470_v42 }
 0x18d   :  { %v2465_v4 = vunpack.i.h.bf16 %v2463_v44  ;;  %v2464_v28 = vunpack.i.l.bf16 %v2463_v44  ;;  %v870_v32 = vpop.permute.xlu1 %869  ;;  %v1953_v46 = vpack.c.bf16 %v904_v45, %v881_v16 }
 0x18e   :  { %v880_v55 = vsel %vm879_vm0, %v870_v32, %v2459_v5 }
 0x18f   :  { %1954 = vmatprep.subr.bf16.mxu0 %v1953_v46  ;;  %v883_v49 = vsel %vm879_vm0, %v2464_v28, %v2465_v4  ;;  %v882_v6 = vsel %vm879_vm0, %v2460_v10, %v2464_v28 }
 0x190   :  { %v2473_v47 = vpop.permute.xlu0 %2472 }
 0x191   :  { %v2475_v15 = vunpack.i.h.bf16 %v2473_v47  ;;  %v2474_v0 = vunpack.i.l.bf16 %v2473_v47  ;;  %v2478_v48 = vpop.permute.xlu1 %2477 }
 0x192   :  { %v2480_v52 = vunpack.i.h.bf16 %v2478_v48  ;;  %v2479_v51 = vunpack.i.l.bf16 %v2478_v48 }
 0x193   :  { %v905_v50 = vsel %vm902_vm7, %v2470_v42, %v2474_v0  ;;  %v906_v53 = vsel %vm902_vm7, %v2474_v0, %v2475_v15 }
 0x194   :  { %v893_v2 = vpop.permute.xlu0 %892  ;;  %v2033_v9 = vpack.c.bf16 %v906_v53, %v883_v49  ;;  %v2035_v54 = vpack.c.bf16 %v905_v50, %v882_v6  ;;  %v927_v60 = vsel %vm925_vm8, %v2479_v51, %v2480_v52 }
 0x195   :  { %v903_v56 = vsel %vm902_vm7, %v893_v2, %v2469_v43  ;;  %v2488_v18 = vpop.permute.xlu1 %2487 }
 0x196   :  { %v1955_v57 = vpack.c.bf16 %v903_v56, %v880_v55  ;;  %2034 = vmatprep.subr.bf16.mxu1 %v2033_v9  ;;  %v2490_v34 = vunpack.i.h.bf16 %v2488_v18  ;;  %v2489_v59 = vunpack.i.l.bf16 %v2488_v18  ;;  %v2644_v9 = vmov 0  }
 0x197   :  { %2036 = vmatpush1.bf16.msra.mxu1 %v2035_v54  ;;  %2496 = vset.pattern.permute.xlu0 %v2644_v9 }
 0x198   :  { %v2483_v1 = vpop.permute.xlu0 %2482  ;;  %1956 = vmatpush1.bf16.msra.mxu0 %v1955_v57  ;;  %v1048_v7 = vsel %vm488_vm5, %v2489_v59, %v2490_v34  ;;  %2497 = vset.pattern.permute.xlu1 %v2644_v9 }
 0x199   :  { %v1957_v61 = vpack.c.bf16 %v1048_v7, %v927_v60  ;;  %v2485_v62 = vunpack.i.h.bf16 %v2483_v1  ;;  %v2484_v8 = vunpack.i.l.bf16 %v2483_v1  ;;  %v916_v14 = vpop.permute.xlu1 %915 }
 0x19a   :  { %v926_v19 = vsel %vm925_vm8, %v916_v14, %v2479_v51 }
 0x19b   :  { %1958 = vmatprep.subr.bf16.mxu0 %v1957_v61  ;;  %v929_v11 = vsel %vm925_vm8, %v2484_v8, %v2485_v62  ;;  %v928_v33 = vsel %vm925_vm8, %v2480_v52, %v2484_v8 }
 0x19c   :  { %v2493_v22 = vpop.permute.xlu0 %2492 }
 0x19d   :  { %v2495_v58 = vunpack.i.h.bf16 %v2493_v22  ;;  %v2494_v12 = vunpack.i.l.bf16 %v2493_v22 }
 0x19f   :  { %v1049_v13 = vsel %vm488_vm5, %v2490_v34, %v2494_v12  ;;  %v1050_v17 = vsel %vm488_vm5, %v2494_v12, %v2495_v58 }
 0x1a0   :  { %v1038_v3 = vpop.permute.xlu0 %1037  ;;  %v2037_v35 = vpack.c.bf16 %v1050_v17, %v929_v11  ;;  %v2039_v36 = vpack.c.bf16 %v1049_v13, %v928_v33 }
 0x1a1   :  { %v1047_v21 = vsel %vm488_vm5, %v1038_v3, %v2489_v59 }
 0x1a2   :  { %v1959_v63 = vpack.c.bf16 %v1047_v21, %v926_v19  ;;  %2038 = vmatprep.subr.bf16.mxu1 %v2037_v35  ;;  %v1707_v19 = vld [vmem:[%s3290_s4] sm:$0xff] }
 0x1a3   :  { %2040 = vmatpush1.bf16.msra.mxu1 %v2039_v36 }
 0x1a4   :  { %1960 = vmatpush1.bf16.msra.mxu0 %v1959_v63 }
 0x1a6   :  { %1615 = vmatmul.mubr.f32.vlgmr.msra.gmra.mrb[0].mxu1 %v1093_v23 }
 0x1a7   :  { %1445 = vmatmul.mubr.f32.vlgmr.msra.gmra.mrb[0].mxu0 %v1093_v23  ;;  %1619 = vmatprep.mubr.f32.mxu1 %v2643_v20 }
 0x1a8   :  { %1449 = vmatprep.mubr.f32.mxu0 %v2643_v20 }
 0x1aa   :  { %1620 = vmatmul.mubr.f32.gmra.mrb[2].mxu1 %v1096_v24 }
 0x1ab   :  { %1450 = vmatmul.mubr.f32.gmra.mrb[2].mxu0 %v1096_v24  ;;  %1624 = vmatprep.mubr.f32.mxu1 %v2643_v20 }
 0x1ac   :  { %1454 = vmatprep.mubr.f32.mxu0 %v2643_v20 }
 0x1ae   :  { %1625 = vmatmul.mubr.f32.gmra.mrb[4].mxu1 %v1099_v25 }
 0x1af   :  { %1455 = vmatmul.mubr.f32.gmra.mrb[4].mxu0 %v1099_v25  ;;  %1629 = vmatprep.mubr.f32.mxu1 %v2643_v20 }
 0x1b0   :  { %1459 = vmatprep.mubr.f32.mxu0 %v2643_v20 }
 0x1b2   :  { %1630 = vmatmul.mubr.f32.gmra.mrb[6].mxu1 %v1102_v26 }
 0x1b3   :  { %1460 = vmatmul.mubr.f32.gmra.mrb[6].mxu0 %v1102_v26  ;;  %v1708_v26 = vld [vmem:[%s3290_s4 + $0x8] sm:$0xff] }
 0x279   :  { %v1616_v27 = vpop.f32.mrb[0].mxu1 }
 0x27a   :  { %v1446_v10 = vpop.f32.mrb[0].mxu0  ;;  %v3202_v5 = vpop.f32.mrb[1].mxu1 }
 0x27b   :  { %v3204_v29 = vpop.f32.mrb[1].mxu0  ;;  %v1668_v30 = vmul.f32 %v3202_v5, %v3202_v5 }
 0x27c   :  { %v1651_v37 = vadd.f32 %v3202_v5, %v3204_v29  ;;  %v1667_v31 = vmul.f32 %v3204_v29, %v3204_v29 }
 0x27d   :  { %v1621_v38 = vpop.f32.mrb[2].mxu1 }
 0x27e   :  { %v1451_v39 = vpop.f32.mrb[2].mxu0  ;;  %v3212_v20 = vpop.f32.mrb[3].mxu1  ;;  %1652 = vadd.xlane.f32.xlu1 %v1651_v37  ;;  %v1675_v40 = vadd.f32 %v1668_v30, %v1667_v31  ;;  %v1715_v31 = vld [vmem:[%s3291_s5] sm:$0xff] }
 0x27f   :  { %v3214_v41 = vpop.f32.mrb[3].mxu0  ;;  %v1670_v42 = vmul.f32 %v3212_v20, %v3212_v20 }
 0x280   :  { %1676 = vadd.xlane.f32.xlu0 %v1675_v40  ;;  %v1669_v43 = vmul.f32 %v3214_v41, %v3214_v41  ;;  %v1654_v16 = vadd.f32 %v3212_v20, %v3214_v41  ;;  %v1709_v40 = vld [vmem:[%s3290_s4 + $0x10] sm:$0xff] }
 0x281   :  { %v1626_v44 = vpop.f32.mrb[4].mxu1 }
 0x282   :  { %v1456_v45 = vpop.f32.mrb[4].mxu0  ;;  %v3222_v4 = vpop.f32.mrb[5].mxu1  ;;  %v1678_v28 = vadd.f32 %v1670_v42, %v1669_v43 }
 0x283   :  { %v3224_v32 = vpop.f32.mrb[5].mxu0  ;;  %v1672_v46 = vmul.f32 %v3222_v4, %v3222_v4 }
 0x284   :  { %1679 = vadd.xlane.f32.xlu1 %v1678_v28  ;;  %1655 = vadd.xlane.f32.xlu0 %v1654_v16  ;;  %v1657_v47 = vadd.f32 %v3222_v4, %v3224_v32  ;;  %v1671_v15 = vmul.f32 %v3224_v32, %v3224_v32  ;;  %v1716_v16 = vld [vmem:[%s3291_s5 + $0x8] sm:$0xff]  ;;  %v1710_v28 = vld [vmem:[%s3290_s4 + $0x18] sm:$0xff]  ;;  %s2645_s4 = smov [#allocation8]  }
 0x285   :  { %v1631_v0 = vpop.f32.mrb[6].mxu1 }
 0x286   :  { %v1461_v48 = vpop.f32.mrb[6].mxu0  ;;  %v3232_v49 = vpop.f32.mrb[7].mxu1  ;;  %v1681_v6 = vadd.f32 %v1672_v46, %v1671_v15  ;;  %v1717_v15 = vld [vmem:[%s3291_s5 + $0x10] sm:$0xff] }
 0x287   :  { %v3234_v50 = vpop.f32.mrb[7].mxu0  ;;  %v1674_v52 = vmul.f32 %v3232_v49, %v3232_v49 }
 0x288   :  { %1658 = vadd.xlane.f32.xlu0 %v1657_v47  ;;  %v1660_v51 = vadd.f32 %v3232_v49, %v3234_v50  ;;  %v1673_v53 = vmul.f32 %v3234_v50, %v3234_v50 }
 0x28a   :  { %1661 = vadd.xlane.f32.xlu1 %v1660_v51  ;;  %v1684_v2 = vadd.f32 %v1674_v52, %v1673_v53 }
 0x28c   :  { %1682 = vadd.xlane.f32.xlu0 %v1681_v6  ;;  %v1718_v6 = vld [vmem:[%s3291_s5 + $0x18] sm:$0xff]  ;;  %s1860_s5 = sshll.u32 %s2645_s4, 4  ;;  %s1861_s5 = int_to_ptr.vmem [resolvable:$true] %s1860_s5 }
 0x28d   :  { %s2571_s25 = scalar_lea.vmem %s1861_s5, 1024  ;;  %p2576_p3 = scmp.lt.s32.totalorder %s1861_s5, %s1861_s5 }
 0x28e   :  { %1685 = vadd.xlane.f32.xlu1 %v1684_v2  ;;  %p2572_p2 = scmp.ne.s32.totalorder %s1861_s5, %s2571_s25  ;;  %p2577_p4 = scmp.lt.s32.totalorder %s2571_s25, %s2571_s25 }
 0x290   :  { %p2578_p5 = por %p2577_p4, %p2576_p3 }
 0x292   :  { %p2579_p6 = pnand %p2578_p5, %p2572_p2 }
 0x30b   :  { %v1653_v54 = vpop.xlane.xlu1 %1652 }
 0x30c   :  { %v1663_v55 = vmul.f32 0.00390625, %v1653_v54 }
 0x30d   :  { %v1677_v56 = vpop.xlane.xlu0 %1676 }
 0x30e   :  { %v1691_v57 = vmul.f32 %v1663_v55, %v1663_v55  ;;  %v1687_v18 = vmul.f32 0.00390625, %v1677_v56 }
 0x310   :  { %v1695_v34 = vsub.f32 %v1687_v18, %v1691_v57 }
 0x311   :  { %v1680_v59 = vpop.xlane.xlu1 %1679  ;;  %v1656_v60 = vpop.xlane.xlu0 %1655 }
 0x312   :  { %v1699_v1 = vadd.f32 1e-05, %v1695_v34  ;;  %v1664_v7 = vmul.f32 0.00390625, %v1656_v60  ;;  %v1688_v61 = vmul.f32 0.00390625, %v1680_v59 }
 0x314   :  { %2498 = vrsqrt.f32 %v1699_v1  ;;  %v1692_v62 = vmul.f32 %v1664_v7, %v1664_v7 }
 0x315   :  { %v1659_v8 = vpop.xlane.xlu0 %1658 }
 0x316   :  { %v1696_v22 = vsub.f32 %v1688_v61, %v1692_v62  ;;  %v1665_v58 = vmul.f32 0.00390625, %v1659_v8 }
 0x317   :  { %v1662_v12 = vpop.xlane.xlu1 %1661 }
 0x318   :  { %v1700_v14 = vadd.f32 1e-05, %v1696_v22  ;;  %v1693_v11 = vmul.f32 %v1665_v58, %v1665_v58  ;;  %v1666_v17 = vmul.f32 0.00390625, %v1662_v12 }
 0x319   :  { %v1683_v13 = vpop.xlane.xlu0 %1682 }
 0x31a   :  { %2500 = vrsqrt.f32 %v1700_v14  ;;  %v1689_v33 = vmul.f32 0.00390625, %v1683_v13  ;;  %v1694_v63 = vmul.f32 %v1666_v17, %v1666_v17 }
 0x31b   :  { %v1686_v3 = vpop.xlane.xlu1 %1685 }
 0x31c   :  { %v1697_v35 = vsub.f32 %v1689_v33, %v1693_v11  ;;  %v1690_v36 = vmul.f32 0.00390625, %v1686_v3 }
 0x31e   :  { %v2499_v21 = vpop.eup %2498  ;;  %v1701_v23 = vadd.f32 1e-05, %v1697_v35  ;;  %v1698_v25 = vsub.f32 %v1690_v36, %v1694_v63 }
 0x31f   :  { %v1711_v24 = vmul.f32 %v2499_v21, %v1707_v19 }
 0x320   :  { %2502 = vrsqrt.f32 %v1701_v23  ;;  %v1702_v10 = vadd.f32 1e-05, %v1698_v25 }
 0x321   :  { %1729 = vperm.xlu0 %2496, %v1711_v24   ;;  %v1719_v37 = vmul.f32 %v1711_v24, %v1663_v55 }
 0x322   :  { %2504 = vrsqrt.f32 %v1702_v10 }
 0x323   :  { %v1723_v38 = vsub.f32 %v1715_v31, %v1719_v37 }
 0x324   :  { %v2501_v27 = vpop.eup %2500 }
 0x325   :  { %v1712_v30 = vmul.f32 %v2501_v27, %v1708_v26 }
 0x327   :  { %1734 = vperm.xlu1 %2497, %v1712_v30   ;;  %v1720_v42 = vmul.f32 %v1712_v30, %v1664_v7 }
 0x329   :  { %v1724_v44 = vsub.f32 %v1716_v16, %v1720_v42 }
 0x32a   :  { %v2503_v39 = vpop.eup %2502 }
 0x32b   :  { %1757 = vperm.xlu1 %2497, %v1723_v38   ;;  %v1713_v43 = vmul.f32 %v2503_v39, %v1709_v40 }
 0x32c   :  { %v2505_v45 = vpop.eup %2504 }
 0x32d   :  { %v1714_v46 = vmul.f32 %v2505_v45, %v1710_v28  ;;  %v1721_v47 = vmul.f32 %v1713_v43, %v1665_v58 }
 0x32f   :  { %1739 = vperm.xlu1 %2497, %v1713_v43   ;;  %v1725_v0 = vsub.f32 %v1717_v15, %v1721_v47  ;;  %v1722_v48 = vmul.f32 %v1714_v46, %v1666_v17 }
 0x331   :  { %v1726_v52 = vsub.f32 %v1718_v6, %v1722_v48 }
 0x333   :  { %1762 = vperm.xlu1 %2497, %v1724_v44  }
 0x337   :  { %1744 = vperm.xlu1 %2497, %v1714_v46  }
 0x33b   :  { %1767 = vperm.xlu1 %2497, %v1725_v0  }
 0x33f   :  { %1772 = vperm.xlu1 %2497, %v1726_v52  }
 0x3a0   :  { %v1730_v51 = vpop.permute.xlu0 %1729 }
 0x3a1   :  { %v1747_v2 = vmul.f32 %v1730_v51, %v3204_v29  ;;  %v1748_v9 = vmul.f32 %v1730_v51, %v3202_v5 }
 0x3a6   :  { %v1735_v53 = vpop.permute.xlu1 %1734 }
 0x3a7   :  { %v1749_v1 = vmul.f32 %v1735_v53, %v3214_v41  ;;  %v1750_v7 = vmul.f32 %v1735_v53, %v3212_v20 }
 0x3aa   :  { %v1758_v54 = vpop.permute.xlu1 %1757 }
 0x3ab   :  { %v1775_v55 = vadd.f32 %v1758_v54, %v1747_v2  ;;  %v1776_v56 = vadd.f32 %v1758_v54, %v1748_v9 }
 0x3ad   :  { %v1791_v57 = vmin.f32 %v1775_v55, 0.0  ;;  %v1792_v18 = vmin.f32 %v1776_v56, 0.0  ;;  %vm1783_vm5 = vcmp.gt.f32.partialorder %v1775_v55, 0.0  ;;  %vm1784_vm9 = vcmp.gt.f32.partialorder %v1776_v56, 0.0 }
 0x3ae   :  { %v1740_v34 = vpop.permute.xlu1 %1739 }
 0x3af   :  { %v1799_v59 = vmul.f32 1.442695, %v1791_v57  ;;  %v1801_v60 = vmul.f32 1.442695, %v1792_v18  ;;  %v1751_v14 = vmul.f32 %v1740_v34, %v3224_v32  ;;  %v1752_v13 = vmul.f32 %v1740_v34, %v3222_v4 }
 0x3b1   :  { %2506 = vpow2.f32 %v1799_v59 }
 0x3b2   :  { %2508 = vpow2.f32 %v1801_v60  ;;  %v1763_v61 = vpop.permute.xlu1 %1762 }
 0x3b3   :  { %v1777_v62 = vadd.f32 %v1763_v61, %v1749_v1  ;;  %v1778_v8 = vadd.f32 %v1763_v61, %v1750_v7 }
 0x3b5   :  { %v1793_v29 = vmin.f32 %v1777_v62, 0.0  ;;  %v1794_v22 = vmin.f32 %v1778_v8, 0.0  ;;  %vm1785_vm10 = vcmp.gt.f32.partialorder %v1777_v62, 0.0  ;;  %vm1786_vm11 = vcmp.gt.f32.partialorder %v1778_v8, 0.0 }
 0x3b6   :  { %v1745_v5 = vpop.permute.xlu1 %1744 }
 0x3b7   :  { %v1803_v58 = vmul.f32 1.442695, %v1793_v29  ;;  %v1805_v12 = vmul.f32 1.442695, %v1794_v22  ;;  %v1753_v36 = vmul.f32 %v1745_v5, %v3234_v50  ;;  %v1754_v19 = vmul.f32 %v1745_v5, %v3232_v49 }
 0x3b9   :  { %2510 = vpow2.f32 %v1803_v58 }
 0x3ba   :  { %2512 = vpow2.f32 %v1805_v12  ;;  %v1768_v11 = vpop.permute.xlu1 %1767 }
 0x3bb   :  { %v2507_v41 = vpop.eup %2506  ;;  %v1779_v17 = vadd.f32 %v1768_v11, %v1751_v14  ;;  %v1780_v20 = vadd.f32 %v1768_v11, %v1752_v13 }
 0x3bc   :  { %v2509_v33 = vpop.eup %2508  ;;  %v1873_v3 = vadd.f32 -1.0, %v2507_v41 }
 0x3bd   :  { %v1874_v35 = vadd.f32 -1.0, %v2509_v33  ;;  %v1795_v21 = vmin.f32 %v1779_v17, 0.0  ;;  %v1796_v23 = vmin.f32 %v1780_v20, 0.0  ;;  %vm1787_vm12 = vcmp.gt.f32.partialorder %v1779_v17, 0.0 }
 0x3be   :  { %v1823_v63 = vmul.f32 1.6732632, %v1873_v3  ;;  %v1773_v32 = vpop.permute.xlu1 %1772  ;;  %vm1788_vm13 = vcmp.gt.f32.partialorder %v1780_v20, 0.0 }
 0x3bf   :  { %v1824_v24 = vmul.f32 1.6732632, %v1874_v35  ;;  %v1807_v4 = vmul.f32 1.442695, %v1795_v21  ;;  %v1781_v25 = vadd.f32 %v1773_v32, %v1753_v36  ;;  %v1782_v26 = vadd.f32 %v1773_v32, %v1754_v19 }
 0x3c0   :  { %v1831_v27 = vsel %vm1783_vm5, %v1775_v55, %v1823_v63  ;;  %v1809_v10 = vmul.f32 1.442695, %v1796_v23 }
 0x3c1   :  { %v1832_v30 = vsel %vm1784_vm9, %v1776_v56, %v1824_v24  ;;  %v1839_v37 = vmul.f32 1.050701, %v1831_v27  ;;  %2514 = vpow2.f32 %v1807_v4  ;;  %v1797_v50 = vmin.f32 %v1781_v25, 0.0 }
 0x3c2   :  { %v1840_v31 = vmul.f32 1.050701, %v1832_v30  ;;  %2516 = vpow2.f32 %v1809_v10  ;;  %v1798_v49 = vmin.f32 %v1782_v26, 0.0  ;;  %vm1789_vm14 = vcmp.gt.f32.partialorder %v1781_v25, 0.0 }
 0x3c3   :  { %v2511_v38 = vpop.eup %2510  ;;  %1847 = vst [vmem:[#allocation8] sm:$0xff] %v1839_v37  ;;  %v1811_v42 = vmul.f32 1.442695, %v1797_v50  ;;  %vm1790_vm15 = vcmp.gt.f32.partialorder %v1782_v26, 0.0 }
 0x3c4   :  { %v2513_v39 = vpop.eup %2512  ;;  %1848 = vst [vmem:[#allocation8 + $0x8] sm:$0xff] %v1840_v31  ;;  %v1875_v40 = vadd.f32 -1.0, %v2511_v38  ;;  %v1813_v16 = vmul.f32 1.442695, %v1798_v49 }
 0x3c5   :  { %v1876_v43 = vadd.f32 -1.0, %v2513_v39  ;;  %2518 = vpow2.f32 %v1811_v42 }
 0x3c6   :  { %v1825_v44 = vmul.f32 1.6732632, %v1875_v40  ;;  %2520 = vpow2.f32 %v1813_v16 }
 0x3c7   :  { %v1826_v45 = vmul.f32 1.6732632, %v1876_v43 }
 0x3c8   :  { %v1833_v28 = vsel %vm1785_vm10, %v1777_v62, %v1825_v44 }
 0x3c9   :  { %v1834_v46 = vsel %vm1786_vm11, %v1778_v8, %v1826_v45  ;;  %v1841_v47 = vmul.f32 1.050701, %v1833_v28 }
 0x3ca   :  { %v1842_v15 = vmul.f32 1.050701, %v1834_v46 }
 0x3cb   :  { %v2515_v0 = vpop.eup %2514  ;;  %1849 = vst [vmem:[#allocation8 + $0x10] sm:$0xff] %v1841_v47 }
 0x3cc   :  { %v2517_v48 = vpop.eup %2516  ;;  %1850 = vst [vmem:[#allocation8 + $0x18] sm:$0xff] %v1842_v15  ;;  %v1877_v6 = vadd.f32 -1.0, %v2515_v0 }
 0x3cd   :  { %v1878_v52 = vadd.f32 -1.0, %v2517_v48 }
 0x3ce   :  { %v1827_v51 = vmul.f32 1.6732632, %v1877_v6 }
 0x3cf   :  { %v1828_v53 = vmul.f32 1.6732632, %v1878_v52  ;;  %v2519_v2 = vpop.eup %2518 }
 0x3d0   :  { %v1835_v9 = vsel %vm1787_vm12, %v1779_v17, %v1827_v51  ;;  %v2521_v54 = vpop.eup %2520  ;;  %v1879_v57 = vadd.f32 -1.0, %v2519_v2 }
 0x3d1   :  { %v1836_v55 = vsel %vm1788_vm13, %v1780_v20, %v1828_v53  ;;  %v1843_v56 = vmul.f32 1.050701, %v1835_v9  ;;  %v1880_v34 = vadd.f32 -1.0, %v2521_v54 }
 0x3d2   :  { %v1844_v18 = vmul.f32 1.050701, %v1836_v55  ;;  %v1829_v59 = vmul.f32 1.6732632, %v1879_v57 }
 0x3d3   :  { %1851 = vst [vmem:[#allocation8 + $0x20] sm:$0xff] %v1843_v56  ;;  %v1830_v60 = vmul.f32 1.6732632, %v1880_v34 }
 0x3d4   :  { %1852 = vst [vmem:[#allocation8 + $0x28] sm:$0xff] %v1844_v18  ;;  %v1837_v1 = vsel %vm1789_vm14, %v1781_v25, %v1829_v59 }
 0x3d5   :  { %v1838_v7 = vsel %vm1790_vm15, %v1782_v26, %v1830_v60  ;;  %v1845_v61 = vmul.f32 1.050701, %v1837_v1 }
 0x3d6   :  { %v1846_v62 = vmul.f32 1.050701, %v1838_v7 }
 0x3d7   :  { %1853 = vst [vmem:[#allocation8 + $0x30] sm:$0xff] %v1845_v61 }
 0x3d8   :  { %1854 = vst [vmem:[#allocation8 + $0x38] sm:$0xff] %v1846_v62 }
 0x3d9   :  { %2582 = shalt.err (!%p2579_p6)
}
 0x3da   :  { %s2583_s27 = scalar_lea.hbm %s3292_s6, 1024 }
 0x3db   :  { %p2584_p7 = scmp.ne.s32.totalorder %s3292_s6, %s2583_s27  ;;  %p2587_p8 = scmp.lt.u32.totalorder %s2583_s27, %s3292_s6 }
 0x3dd   :  { %p2589_p9 = pnand %p2587_p8, %p2584_p7 }
 0x3df   :  { %2592 = shalt.err (!%p2589_p9)
}
 0x3e0   :  { %s2646_s7 = smov 256   ;;  %s2647_s9 = smov 16  }
 0x3e1   :  { %1866 = dma.vmem_to_hbm [thread:$0]  %s1861_s5, 1024, %s3292_s6, [#allocation5], %s2646_s7, %s2646_s7, %s2647_s9  }
 0x3e2   :  { %2597 = dma.done.wait [#allocation5], 1024  }
 0x3e3   :  { %2598 = vsyncadd [#allocation5], 4294966272 }
 0x3e4   :  { %1870 = vsyncpa [#allocation4], 1 }
 0x3e5   :  { %1871 = vsyncpa [#allocation7], 1 }
 0x3e6   :  { %1872 = vsyncpa [#allocation5], 1 }

</bundles_post_ra>
